<compile_context>
chip_gen: v7x
topology: tpu7x:2x2x1
jax: 0.10.0
libtpu: 0.0.40
codegen_flags: <defaults>
</compile_context>

<pallas_src>
import jax
import jax.numpy as jnp
from jax.experimental import pallas as pl
from jax.experimental.pallas import tpu as pltpu

# ----------------------------- model sizes (small, per instructions) ---------
VOCAB = 128      # vocab_size (len(embedding)); also the lane width
EMBED = 32       # embedding dim (GRU input size)
HIDDEN = 32      # hidden_size
BATCH = 8        # full f32 sublane tile (perf feedback: free vs. B=2)
SEQ = 8
LANE = 128
G3 = 3 * LANE    # per-gate 128-lane tiles: r -> [0:128), z -> [128:256), n -> [256:384)


# ----------------------------- fused forward kernel --------------------------
def lm_fused_kernel(tok_ref, len_ref, eg_ref, whh_ref, bhn_ref, wout_ref, bout_ref,
                    out_ref, gi_scr, hout_scr):
    """One-hot @ (embedding@W_ih + b) for all steps (hoisted) -> GRU recurrence
    (only h@W_hh on the chain) -> batched vocab projection + log_softmax."""
    SB = tok_ref.shape[0]            # S*B, time-major (row = t*B + b)
    B = len_ref.shape[0]
    S = SB // B

    toks = tok_ref[...]              # (S*B, 1) int32 token ids, time-major
    lens = len_ref[...]              # (B, 1)   int32 lengths
    emb_gates = eg_ref[...]          # (V=128, 3*128)  embedding @ W_ih + folded biases
    w_hh = whh_ref[...]              # (128, 3*128)    rows [H:] zero
    b_hn = bhn_ref[...]              # (1, 128)        lanes [H:] zero
    w_out = wout_ref[...]            # (128, 128)      rows [H:] zero
    b_out = bout_ref[...]            # (1, 128)

    # --- hoisted: embedding lookup + input projection for ALL timesteps ------
    lane_ids = jax.lax.broadcasted_iota(jnp.int32, (SB, LANE), 1)
    onehot = (lane_ids == toks).astype(jnp.float32)                       # (S*B, 128)
    gi_scr[...] = jnp.dot(onehot, emb_gates,
                          preferred_element_type=jnp.float32)             # (S*B, 3*128)

    # --- recurrence: only h @ W_hh + gate math on the dependent chain --------
    h = jnp.zeros((B, LANE), jnp.float32)        # lanes [H:] stay exactly zero
    for t in range(S):                           # static unroll (S small)
        gi = gi_scr[pl.ds(t * B, B), :]          # (B, 3*128); independent of h
        gh = jnp.dot(h, w_hh, preferred_element_type=jnp.float32)         # (B, 3*128)

        # full-lane-tile slices -> no lane rotation / masked selects
        r = jax.nn.sigmoid(gi[:, 0:LANE] + gh[:, 0:LANE])
        z = jax.nn.sigmoid(gi[:, LANE:2 * LANE] + gh[:, LANE:2 * LANE])
        n = jnp.tanh(gi[:, 2 * LANE:3 * LANE]
                     + r * (gh[:, 2 * LANE:3 * LANE] + b_hn))
        h_new = (1.0 - z) * n + z * h

        valid = lens > t                                                   # (B, 1)
        h = jnp.where(valid, h_new, h)                    # freeze hidden past length
        hout_scr[pl.ds(t * B, B), :] = jnp.where(valid, h_new, 0.0)        # zero padded outs

    # --- hoisted: vocab projection + log_softmax + one full unmasked store ---
    h_all = hout_scr[...]                                                  # (S*B, 128)
    logits = jnp.dot(h_all, w_out, preferred_element_type=jnp.float32) + b_out
    m = jnp.max(logits, axis=-1, keepdims=True)
    lse = jnp.log(jnp.sum(jnp.exp(logits - m), axis=-1, keepdims=True)) + m
    out_ref[...] = (logits - lse).reshape(out_ref.shape)                   # (S, B, V)


def run_language_model(toks_flat, lens, kp):
    """toks_flat: (S*B, 1) int32 time-major; lens: (B, 1) int32.
    Returns (S, B, V) log-probs (time-major; wrapper transposes to batch-first)."""
    SB = toks_flat.shape[0]
    B = lens.shape[0]
    S = SB // B
    V = kp["w_out_pad"].shape[-1]
    G = kp["emb_gates"].shape[-1]

    return pl.pallas_call(
        lm_fused_kernel,
        out_shape=jax.ShapeDtypeStruct((S, B, V), jnp.float32),
        # no grid / BlockSpecs: single invocation, whole (tiny) arrays resident in VMEM
        scratch_shapes=[
            pltpu.VMEM((SB, G), jnp.float32),     # gi for all timesteps
            pltpu.VMEM((SB, LANE), jnp.float32),  # h_out for all timesteps
        ],
    )(toks_flat, lens, kp["emb_gates"], kp["w_hh_pad"], kp["b_hn_pad"],
      kp["w_out_pad"], kp["b_out"])


@jax.jit
def language_model_forward(sentence, sen_length, kparams):
    """sentence: (B, S) int32 ids; sen_length: (B,) int32.
    Returns (B, S, V) float32 log-probabilities (batch-first, like the module)."""
    B, S = sentence.shape
    toks_flat = jnp.transpose(sentence.astype(jnp.int32)).reshape(S * B, 1)  # time-major
    lens = sen_length.astype(jnp.int32).reshape(B, 1)
    out_sbv = run_language_model(toks_flat, lens, kparams)                   # (S, B, V)
    return jnp.transpose(out_sbv, (1, 0, 2))                                 # (B, S, V)


# ----------------------------- parameter init & packing ----------------------
def init_params(key):
    """Logical (per-gate, PyTorch-style) parameters. Gate order: (r, z, n)."""
    ks = jax.random.split(key, 7)
    scale = 0.1
    return {
        "embedding": scale * jax.random.normal(ks[0], (VOCAB, EMBED), jnp.float32),
        # stored transposed for x @ W form: (3, in, H)
        "w_ih": scale * jax.random.normal(ks[1], (3, EMBED, HIDDEN), jnp.float32),
        "w_hh": scale * jax.random.normal(ks[2], (3, HIDDEN, HIDDEN), jnp.float32),
        "b_ih": scale * jax.random.normal(ks[3], (3, 1, HIDDEN), jnp.float32),
        "b_hh": scale * jax.random.normal(ks[4], (3, 1, HIDDEN), jnp.float32),
        # output vocab projection (Linear(hidden, vocab)), stored transposed
        "w_out_t": scale * jax.random.normal(ks[5], (HIDDEN, VOCAB), jnp.float32),
        "b_out": scale * jax.random.normal(ks[6], (1, VOCAB), jnp.float32),
    }


def pack_params(p):
    """Kernel layout: per-gate 128-lane tiles, embedding folded into W_ih, folded biases.
    All pad lanes/rows are exactly zero (required for the pad-lane invariants)."""
    H = HIDDEN

    # W_ih with each gate in its own 128-lane tile
    w_ih_pad = jnp.zeros((EMBED, G3), jnp.float32)
    b_x_pad = jnp.zeros((1, G3), jnp.float32)
    folded_b = [p["b_ih"][0] + p["b_hh"][0],   # r: b_ir + b_hr
                p["b_ih"][1] + p["b_hh"][1],   # z: b_iz + b_hz
                p["b_ih"][2]]                  # n: b_in only (b_hn stays inside r*(...))
    for g in range(3):
        w_ih_pad = w_ih_pad.at[:, g * LANE:g * LANE + H].set(p["w_ih"][g])
        b_x_pad = b_x_pad.at[:, g * LANE:g * LANE + H].set(folded_b[g])

    # fold embedding into the input projection: one-hot @ emb_gates == emb[tok] @ W_ih + b
    emb_gates = p["embedding"] @ w_ih_pad + b_x_pad            # (V, 3*128)

    # W_hh: per-gate 128-lane tiles, 128 input rows (rows [H:] zero since h pad lanes are zero)
    w_hh_pad = jnp.zeros((LANE, G3), jnp.float32)
    for g in range(3):
        w_hh_pad = w_hh_pad.at[:H, g * LANE:g * LANE + H].set(p["w_hh"][g])

    b_hn_pad = jnp.zeros((1, LANE), jnp.float32).at[:, :H].set(p["b_hh"][2])
    w_out_pad = jnp.zeros((LANE, VOCAB), jnp.float32).at[:H, :].set(p["w_out_t"])

    return {
        "emb_gates": emb_gates,
        "w_hh_pad": w_hh_pad,
        "b_hn_pad": b_hn_pad,
        "w_out_pad": w_out_pad,
        "b_out": p["b_out"],
    }


# ----------------------------- pure-JAX reference (for checking) -------------
def reference_forward(sentence, sen_length, params):
    emb = params["embedding"]
    x = jnp.take(emb, sentence, axis=0)             # (B, S, E)
    B, S, _ = x.shape

    def step(h, inputs):
        x_t, valid = inputs                          # (B,E), (B,1)
        i_r = x_t @ params["w_ih"][0] + params["b_ih"][0]
        i_z = x_t @ params["w_ih"][1] + params["b_ih"][1]
        i_n = x_t @ params["w_ih"][2] + params["b_ih"][2]
        h_r = h @ params["w_hh"][0] + params["b_hh"][0]
        h_z = h @ params["w_hh"][1] + params["b_hh"][1]
        h_n = h @ params["w_hh"][2] + params["b_hh"][2]
        r = jax.nn.sigmoid(i_r + h_r)
        z = jax.nn.sigmoid(i_z + h_z)
        n = jnp.tanh(i_n + r * h_n)
        h_new = (1.0 - z) * n + z * h
        h_next = jnp.where(valid, h_new, h)
        out = jnp.where(valid, h_new, 0.0)
        return h_next, out

    ts = jnp.arange(S)[:, None, None]                          # (S,1,1)
    valid = (sen_length.reshape(1, -1, 1) > ts)                # (S,B,1)
    x_tm = jnp.transpose(x, (1, 0, 2))                         # (S,B,E)
    _, outs = jax.lax.scan(step, jnp.zeros((B, HIDDEN), jnp.float32), (x_tm, valid))
    logits = outs @ params["w_out_t"] + params["b_out"]        # (S,B,V)
    logp = jax.nn.log_softmax(logits, axis=-1)
    return jnp.transpose(logp, (1, 0, 2))


# TODO(synk): baseLangRNN source is unavailable; assumed structure is
# embedding -> packed 1-layer GRU -> Linear(hidden, vocab) -> log_softmax,
# with zero GRU outputs at padded positions (pack/pad semantics).
# Pickle wordDict loading, .npy embedding loading, and dropout (p=0) are
# host-side / no-ops and are not part of the kernel.

if __name__ == "__main__":
    key = jax.random.PRNGKey(0)
    k_tok, k_param = jax.random.split(key)

    params = init_params(k_param)
    kparams = pack_params(params)

    sentence = jax.random.randint(k_tok, (BATCH, SEQ), 0, VOCAB, dtype=jnp.int32)
    sen_length = jnp.array([SEQ, 5, SEQ, 3, 6, SEQ, 1, 7], dtype=jnp.int32)

    out = language_model_forward(sentence, sen_length, kparams)
    out = jax.block_until_ready(out)

    ref = reference_forward(sentence, sen_length, params)
    assert out.shape == (BATCH, SEQ, VOCAB), out.shape
    assert jnp.allclose(out, ref, atol=1e-2, rtol=1e-2), "mismatch vs reference"

    print("KERNEL_OK")
</pallas_src>

<mosaic_0001>
module attributes {stable_mosaic.version = 11 : i64} {
  func.func @lm_fused_kernel(%arg0: memref<64x1xi32, #tpu.memory_space<vmem>>, %arg1: memref<8x1xi32, #tpu.memory_space<vmem>>, %arg2: memref<128x384xf32, #tpu.memory_space<vmem>>, %arg3: memref<128x384xf32, #tpu.memory_space<vmem>>, %arg4: memref<1x128xf32, #tpu.memory_space<vmem>>, %arg5: memref<128x128xf32, #tpu.memory_space<vmem>>, %arg6: memref<1x128xf32, #tpu.memory_space<vmem>>, %arg7: memref<8x8x128xf32, #tpu.memory_space<vmem>>, %arg8: memref<64x384xf32, #tpu.memory_space<vmem>>, %arg9: memref<64x128xf32, #tpu.memory_space<vmem>>) attributes {dimension_semantics = [], scalar_prefetch = 0 : i64, scratch_operands = 2 : i64, tpu.core_type = #tpu.core_type<tc>} {
    %c0 = arith.constant 0 : index
    %c0_0 = arith.constant 0 : index
    %0 = vector.load %arg0[%c0, %c0_0] : memref<64x1xi32, #tpu.memory_space<vmem>>, vector<64x1xi32>
    %c0_1 = arith.constant 0 : index
    %c0_2 = arith.constant 0 : index
    %1 = vector.load %arg1[%c0_1, %c0_2] : memref<8x1xi32, #tpu.memory_space<vmem>>, vector<8x1xi32>
    %c0_3 = arith.constant 0 : index
    %c0_4 = arith.constant 0 : index
    %2 = vector.load %arg2[%c0_3, %c0_4] : memref<128x384xf32, #tpu.memory_space<vmem>>, vector<128x384xf32>
    %c0_5 = arith.constant 0 : index
    %c0_6 = arith.constant 0 : index
    %3 = vector.load %arg3[%c0_5, %c0_6] : memref<128x384xf32, #tpu.memory_space<vmem>>, vector<128x384xf32>
    %c0_7 = arith.constant 0 : index
    %c0_8 = arith.constant 0 : index
    %4 = vector.load %arg4[%c0_7, %c0_8] : memref<1x128xf32, #tpu.memory_space<vmem>>, vector<1x128xf32>
    %c0_9 = arith.constant 0 : index
    %c0_10 = arith.constant 0 : index
    %5 = vector.load %arg5[%c0_9, %c0_10] : memref<128x128xf32, #tpu.memory_space<vmem>>, vector<128x128xf32>
    %c0_11 = arith.constant 0 : index
    %c0_12 = arith.constant 0 : index
    %6 = vector.load %arg6[%c0_11, %c0_12] : memref<1x128xf32, #tpu.memory_space<vmem>>, vector<1x128xf32>
    %7 = tpu.iota {dimensions = array<i32: 1>} : vector<64x128xi32>
    %8 = vector.broadcast %0 : vector<64x1xi32> to vector<64x128xi32>
    %9 = arith.cmpi eq, %7, %8 : vector<64x128xi32>
    %10 = arith.extui %9 : vector<64x128xi1> to vector<64x128xi32>
    %11 = arith.sitofp %10 : vector<64x128xi32> to vector<64x128xf32>
    %cst = arith.constant dense<0.000000e+00> : vector<64x384xf32>
    %12 = tpu.matmul %11, %2, %cst {dimension_numbers = #tpu.dot_dimension_numbers<[1], [0], [0], [1], [0, 0, 1, 1], [], []>} : vector<64x128xf32>, vector<128x384xf32>, vector<64x384xf32> -> vector<64x384xf32>
    %c0_13 = arith.constant 0 : index
    %c0_14 = arith.constant 0 : index
    %13 = vector.load %arg8[%c0_13, %c0_14] : memref<64x384xf32, #tpu.memory_space<vmem>>, vector<64x384xf32>
    tpu.vector_store %arg8[%c0_13, %c0_14], %12 {strides = array<i32>} : memref<64x384xf32, #tpu.memory_space<vmem>>, vector<64x384xf32>,
    %cst_15 = arith.constant 0.000000e+00 : f32
    %14 = vector.broadcast %cst_15 : f32 to vector<8x128xf32>
    %c0_16 = arith.constant 0 : index
    %c0_17 = arith.constant 0 : index
    %15 = vector.load %arg8[%c0_16, %c0_17] : memref<64x384xf32, #tpu.memory_space<vmem>>, vector<8x384xf32>
    %cst_18 = arith.constant dense<0.000000e+00> : vector<8x384xf32>
    %16 = tpu.matmul %14, %3, %cst_18 {dimension_numbers = #tpu.dot_dimension_numbers<[1], [0], [0], [1], [0, 0, 1, 1], [], []>} : vector<8x128xf32>, vector<128x384xf32>, vector<8x384xf32> -> vector<8x384xf32>
    %17 = vector.extract_strided_slice %15 {offsets = [0, 0], sizes = [8, 128], strides = [1, 1]} : vector<8x384xf32> to vector<8x128xf32>
    %18 = vector.extract_strided_slice %16 {offsets = [0, 0], sizes = [8, 128], strides = [1, 1]} : vector<8x384xf32> to vector<8x128xf32>
    %19 = arith.addf %17, %18 : vector<8x128xf32>
    %20 = arith.negf %19 : vector<8x128xf32>
    %21 = math.exp %20 : vector<8x128xf32>
    %cst_19 = arith.constant 1.000000e+00 : f32
    %22 = vector.broadcast %cst_19 : f32 to vector<8x128xf32>
    %23 = arith.addf %22, %21 : vector<8x128xf32>
    %24 = arith.divf %22, %23 : vector<8x128xf32>
    %25 = vector.extract_strided_slice %15 {offsets = [0, 128], sizes = [8, 128], strides = [1, 1]} : vector<8x384xf32> to vector<8x128xf32>
    %26 = vector.extract_strided_slice %16 {offsets = [0, 128], sizes = [8, 128], strides = [1, 1]} : vector<8x384xf32> to vector<8x128xf32>
    %27 = arith.addf %25, %26 : vector<8x128xf32>
    %28 = arith.negf %27 : vector<8x128xf32>
    %29 = math.exp %28 : vector<8x128xf32>
    %cst_20 = arith.constant 1.000000e+00 : f32
    %30 = vector.broadcast %cst_20 : f32 to vector<8x128xf32>
    %31 = arith.addf %30, %29 : vector<8x128xf32>
    %32 = arith.divf %30, %31 : vector<8x128xf32>
    %33 = vector.extract_strided_slice %15 {offsets = [0, 256], sizes = [8, 128], strides = [1, 1]} : vector<8x384xf32> to vector<8x128xf32>
    %34 = vector.extract_strided_slice %16 {offsets = [0, 256], sizes = [8, 128], strides = [1, 1]} : vector<8x384xf32> to vector<8x128xf32>
    %35 = vector.broadcast %4 : vector<1x128xf32> to vector<8x128xf32>
    %36 = arith.addf %34, %35 : vector<8x128xf32>
    %37 = arith.mulf %24, %36 : vector<8x128xf32>
    %38 = arith.addf %33, %37 : vector<8x128xf32>
    %39 = math.tanh %38 : vector<8x128xf32>
    %cst_21 = arith.constant 1.000000e+00 : f32
    %40 = vector.broadcast %cst_21 : f32 to vector<8x128xf32>
    %41 = arith.subf %40, %32 : vector<8x128xf32>
    %42 = arith.mulf %41, %39 : vector<8x128xf32>
    %43 = arith.mulf %32, %14 : vector<8x128xf32>
    %44 = arith.addf %42, %43 : vector<8x128xf32>
    %c0_i32 = arith.constant 0 : i32
    %45 = vector.broadcast %c0_i32 : i32 to vector<8x1xi32>
    %46 = arith.cmpi sgt, %1, %45 : vector<8x1xi32>
    %47 = vector.shape_cast %46 : vector<8x1xi1> to vector<8x1xi1>
    %48 = vector.broadcast %47 : vector<8x1xi1> to vector<8x128xi1>
    %49 = arith.select %48, %44, %14 : vector<8x128xi1>, vector<8x128xf32>
    %cst_22 = arith.constant 0.000000e+00 : f32
    %50 = vector.shape_cast %46 : vector<8x1xi1> to vector<8x1xi1>
    %51 = vector.broadcast %50 : vector<8x1xi1> to vector<8x128xi1>
    %52 = vector.broadcast %cst_22 : f32 to vector<8x128xf32>
    %53 = arith.select %51, %44, %52 : vector<8x128xi1>, vector<8x128xf32>
    %c0_23 = arith.constant 0 : index
    %c0_24 = arith.constant 0 : index
    %54 = vector.load %arg9[%c0_23, %c0_24] : memref<64x128xf32, #tpu.memory_space<vmem>>, vector<8x128xf32>
    tpu.vector_store %arg9[%c0_23, %c0_24], %53 {strides = array<i32>} : memref<64x128xf32, #tpu.memory_space<vmem>>, vector<8x128xf32>,
    %c8 = arith.constant 8 : index
    %c0_25 = arith.constant 0 : index
    %55 = vector.load %arg8[%c8, %c0_25] : memref<64x384xf32, #tpu.memory_space<vmem>>, vector<8x384xf32>
    %cst_26 = arith.constant dense<0.000000e+00> : vector<8x384xf32>
    %56 = tpu.matmul %49, %3, %cst_26 {dimension_numbers = #tpu.dot_dimension_numbers<[1], [0], [0], [1], [0, 0, 1, 1], [], []>} : vector<8x128xf32>, vector<128x384xf32>, vector<8x384xf32> -> vector<8x384xf32>
    %57 = vector.extract_strided_slice %55 {offsets = [0, 0], sizes = [8, 128], strides = [1, 1]} : vector<8x384xf32> to vector<8x128xf32>
    %58 = vector.extract_strided_slice %56 {offsets = [0, 0], sizes = [8, 128], strides = [1, 1]} : vector<8x384xf32> to vector<8x128xf32>
    %59 = arith.addf %57, %58 : vector<8x128xf32>
    %60 = arith.negf %59 : vector<8x128xf32>
    %61 = math.exp %60 : vector<8x128xf32>
    %cst_27 = arith.constant 1.000000e+00 : f32
    %62 = vector.broadcast %cst_27 : f32 to vector<8x128xf32>
    %63 = arith.addf %62, %61 : vector<8x128xf32>
    %64 = arith.divf %62, %63 : vector<8x128xf32>
    %65 = vector.extract_strided_slice %55 {offsets = [0, 128], sizes = [8, 128], strides = [1, 1]} : vector<8x384xf32> to vector<8x128xf32>
    %66 = vector.extract_strided_slice %56 {offsets = [0, 128], sizes = [8, 128], strides = [1, 1]} : vector<8x384xf32> to vector<8x128xf32>
    %67 = arith.addf %65, %66 : vector<8x128xf32>
    %68 = arith.negf %67 : vector<8x128xf32>
    %69 = math.exp %68 : vector<8x128xf32>
    %cst_28 = arith.constant 1.000000e+00 : f32
    %70 = vector.broadcast %cst_28 : f32 to vector<8x128xf32>
    %71 = arith.addf %70, %69 : vector<8x128xf32>
    %72 = arith.divf %70, %71 : vector<8x128xf32>
    %73 = vector.extract_strided_slice %55 {offsets = [0, 256], sizes = [8, 128], strides = [1, 1]} : vector<8x384xf32> to vector<8x128xf32>
    %74 = vector.extract_strided_slice %56 {offsets = [0, 256], sizes = [8, 128], strides = [1, 1]} : vector<8x384xf32> to vector<8x128xf32>
    %75 = vector.broadcast %4 : vector<1x128xf32> to vector<8x128xf32>
    %76 = arith.addf %74, %75 : vector<8x128xf32>
    %77 = arith.mulf %64, %76 : vector<8x128xf32>
    %78 = arith.addf %73, %77 : vector<8x128xf32>
    %79 = math.tanh %78 : vector<8x128xf32>
    %cst_29 = arith.constant 1.000000e+00 : f32
    %80 = vector.broadcast %cst_29 : f32 to vector<8x128xf32>
    %81 = arith.subf %80, %72 : vector<8x128xf32>
    %82 = arith.mulf %81, %79 : vector<8x128xf32>
    %83 = arith.mulf %72, %49 : vector<8x128xf32>
    %84 = arith.addf %82, %83 : vector<8x128xf32>
    %c1_i32 = arith.constant 1 : i32
    %85 = vector.broadcast %c1_i32 : i32 to vector<8x1xi32>
    %86 = arith.cmpi sgt, %1, %85 : vector<8x1xi32>
    %87 = vector.shape_cast %86 : vector<8x1xi1> to vector<8x1xi1>
    %88 = vector.broadcast %87 : vector<8x1xi1> to vector<8x128xi1>
    %89 = arith.select %88, %84, %49 : vector<8x128xi1>, vector<8x128xf32>
    %cst_30 = arith.constant 0.000000e+00 : f32
    %90 = vector.shape_cast %86 : vector<8x1xi1> to vector<8x1xi1>
    %91 = vector.broadcast %90 : vector<8x1xi1> to vector<8x128xi1>
    %92 = vector.broadcast %cst_30 : f32 to vector<8x128xf32>
    %93 = arith.select %91, %84, %92 : vector<8x128xi1>, vector<8x128xf32>
    %c8_31 = arith.constant 8 : index
    %c0_32 = arith.constant 0 : index
    %94 = vector.load %arg9[%c8_31, %c0_32] : memref<64x128xf32, #tpu.memory_space<vmem>>, vector<8x128xf32>
    tpu.vector_store %arg9[%c8_31, %c0_32], %93 {strides = array<i32>} : memref<64x128xf32, #tpu.memory_space<vmem>>, vector<8x128xf32>,
    %c16 = arith.constant 16 : index
    %c0_33 = arith.constant 0 : index
    %95 = vector.load %arg8[%c16, %c0_33] : memref<64x384xf32, #tpu.memory_space<vmem>>, vector<8x384xf32>
    %cst_34 = arith.constant dense<0.000000e+00> : vector<8x384xf32>
    %96 = tpu.matmul %89, %3, %cst_34 {dimension_numbers = #tpu.dot_dimension_numbers<[1], [0], [0], [1], [0, 0, 1, 1], [], []>} : vector<8x128xf32>, vector<128x384xf32>, vector<8x384xf32> -> vector<8x384xf32>
    %97 = vector.extract_strided_slice %95 {offsets = [0, 0], sizes = [8, 128], strides = [1, 1]} : vector<8x384xf32> to vector<8x128xf32>
    %98 = vector.extract_strided_slice %96 {offsets = [0, 0], sizes = [8, 128], strides = [1, 1]} : vector<8x384xf32> to vector<8x128xf32>
    %99 = arith.addf %97, %98 : vector<8x128xf32>
    %100 = arith.negf %99 : vector<8x128xf32>
    %101 = math.exp %100 : vector<8x128xf32>
    %cst_35 = arith.constant 1.000000e+00 : f32
    %102 = vector.broadcast %cst_35 : f32 to vector<8x128xf32>
    %103 = arith.addf %102, %101 : vector<8x128xf32>
    %104 = arith.divf %102, %103 : vector<8x128xf32>
    %105 = vector.extract_strided_slice %95 {offsets = [0, 128], sizes = [8, 128], strides = [1, 1]} : vector<8x384xf32> to vector<8x128xf32>
    %106 = vector.extract_strided_slice %96 {offsets = [0, 128], sizes = [8, 128], strides = [1, 1]} : vector<8x384xf32> to vector<8x128xf32>
    %107 = arith.addf %105, %106 : vector<8x128xf32>
    %108 = arith.negf %107 : vector<8x128xf32>
    %109 = math.exp %108 : vector<8x128xf32>
    %cst_36 = arith.constant 1.000000e+00 : f32
    %110 = vector.broadcast %cst_36 : f32 to vector<8x128xf32>
    %111 = arith.addf %110, %109 : vector<8x128xf32>
    %112 = arith.divf %110, %111 : vector<8x128xf32>
    %113 = vector.extract_strided_slice %95 {offsets = [0, 256], sizes = [8, 128], strides = [1, 1]} : vector<8x384xf32> to vector<8x128xf32>
    %114 = vector.extract_strided_slice %96 {offsets = [0, 256], sizes = [8, 128], strides = [1, 1]} : vector<8x384xf32> to vector<8x128xf32>
    %115 = vector.broadcast %4 : vector<1x128xf32> to vector<8x128xf32>
    %116 = arith.addf %114, %115 : vector<8x128xf32>
    %117 = arith.mulf %104, %116 : vector<8x128xf32>
    %118 = arith.addf %113, %117 : vector<8x128xf32>
    %119 = math.tanh %118 : vector<8x128xf32>
    %cst_37 = arith.constant 1.000000e+00 : f32
    %120 = vector.broadcast %cst_37 : f32 to vector<8x128xf32>
    %121 = arith.subf %120, %112 : vector<8x128xf32>
    %122 = arith.mulf %121, %119 : vector<8x128xf32>
    %123 = arith.mulf %112, %89 : vector<8x128xf32>
    %124 = arith.addf %122, %123 : vector<8x128xf32>
    %c2_i32 = arith.constant 2 : i32
    %125 = vector.broadcast %c2_i32 : i32 to vector<8x1xi32>
    %126 = arith.cmpi sgt, %1, %125 : vector<8x1xi32>
    %127 = vector.shape_cast %126 : vector<8x1xi1> to vector<8x1xi1>
    %128 = vector.broadcast %127 : vector<8x1xi1> to vector<8x128xi1>
    %129 = arith.select %128, %124, %89 : vector<8x128xi1>, vector<8x128xf32>
    %cst_38 = arith.constant 0.000000e+00 : f32
    %130 = vector.shape_cast %126 : vector<8x1xi1> to vector<8x1xi1>
    %131 = vector.broadcast %130 : vector<8x1xi1> to vector<8x128xi1>
    %132 = vector.broadcast %cst_38 : f32 to vector<8x128xf32>
    %133 = arith.select %131, %124, %132 : vector<8x128xi1>, vector<8x128xf32>
    %c16_39 = arith.constant 16 : index
    %c0_40 = arith.constant 0 : index
    %134 = vector.load %arg9[%c16_39, %c0_40] : memref<64x128xf32, #tpu.memory_space<vmem>>, vector<8x128xf32>
    tpu.vector_store %arg9[%c16_39, %c0_40], %133 {strides = array<i32>} : memref<64x128xf32, #tpu.memory_space<vmem>>, vector<8x128xf32>,
    %c24 = arith.constant 24 : index
    %c0_41 = arith.constant 0 : index
    %135 = vector.load %arg8[%c24, %c0_41] : memref<64x384xf32, #tpu.memory_space<vmem>>, vector<8x384xf32>
    %cst_42 = arith.constant dense<0.000000e+00> : vector<8x384xf32>
    %136 = tpu.matmul %129, %3, %cst_42 {dimension_numbers = #tpu.dot_dimension_numbers<[1], [0], [0], [1], [0, 0, 1, 1], [], []>} : vector<8x128xf32>, vector<128x384xf32>, vector<8x384xf32> -> vector<8x384xf32>
    %137 = vector.extract_strided_slice %135 {offsets = [0, 0], sizes = [8, 128], strides = [1, 1]} : vector<8x384xf32> to vector<8x128xf32>
    %138 = vector.extract_strided_slice %136 {offsets = [0, 0], sizes = [8, 128], strides = [1, 1]} : vector<8x384xf32> to vector<8x128xf32>
    %139 = arith.addf %137, %138 : vector<8x128xf32>
    %140 = arith.negf %139 : vector<8x128xf32>
    %141 = math.exp %140 : vector<8x128xf32>
    %cst_43 = arith.constant 1.000000e+00 : f32
    %142 = vector.broadcast %cst_43 : f32 to vector<8x128xf32>
    %143 = arith.addf %142, %141 : vector<8x128xf32>
    %144 = arith.divf %142, %143 : vector<8x128xf32>
    %145 = vector.extract_strided_slice %135 {offsets = [0, 128], sizes = [8, 128], strides = [1, 1]} : vector<8x384xf32> to vector<8x128xf32>
    %146 = vector.extract_strided_slice %136 {offsets = [0, 128], sizes = [8, 128], strides = [1, 1]} : vector<8x384xf32> to vector<8x128xf32>
    %147 = arith.addf %145, %146 : vector<8x128xf32>
    %148 = arith.negf %147 : vector<8x128xf32>
    %149 = math.exp %148 : vector<8x128xf32>
    %cst_44 = arith.constant 1.000000e+00 : f32
    %150 = vector.broadcast %cst_44 : f32 to vector<8x128xf32>
    %151 = arith.addf %150, %149 : vector<8x128xf32>
    %152 = arith.divf %150, %151 : vector<8x128xf32>
    %153 = vector.extract_strided_slice %135 {offsets = [0, 256], sizes = [8, 128], strides = [1, 1]} : vector<8x384xf32> to vector<8x128xf32>
    %154 = vector.extract_strided_slice %136 {offsets = [0, 256], sizes = [8, 128], strides = [1, 1]} : vector<8x384xf32> to vector<8x128xf32>
    %155 = vector.broadcast %4 : vector<1x128xf32> to vector<8x128xf32>
    %156 = arith.addf %154, %155 : vector<8x128xf32>
    %157 = arith.mulf %144, %156 : vector<8x128xf32>
    %158 = arith.addf %153, %157 : vector<8x128xf32>
    %159 = math.tanh %158 : vector<8x128xf32>
    %cst_45 = arith.constant 1.000000e+00 : f32
    %160 = vector.broadcast %cst_45 : f32 to vector<8x128xf32>
    %161 = arith.subf %160, %152 : vector<8x128xf32>
    %162 = arith.mulf %161, %159 : vector<8x128xf32>
    %163 = arith.mulf %152, %129 : vector<8x128xf32>
    %164 = arith.addf %162, %163 : vector<8x128xf32>
    %c3_i32 = arith.constant 3 : i32
    %165 = vector.broadcast %c3_i32 : i32 to vector<8x1xi32>
    %166 = arith.cmpi sgt, %1, %165 : vector<8x1xi32>
    %167 = vector.shape_cast %166 : vector<8x1xi1> to vector<8x1xi1>
    %168 = vector.broadcast %167 : vector<8x1xi1> to vector<8x128xi1>
    %169 = arith.select %168, %164, %129 : vector<8x128xi1>, vector<8x128xf32>
    %cst_46 = arith.constant 0.000000e+00 : f32
    %170 = vector.shape_cast %166 : vector<8x1xi1> to vector<8x1xi1>
    %171 = vector.broadcast %170 : vector<8x1xi1> to vector<8x128xi1>
    %172 = vector.broadcast %cst_46 : f32 to vector<8x128xf32>
    %173 = arith.select %171, %164, %172 : vector<8x128xi1>, vector<8x128xf32>
    %c24_47 = arith.constant 24 : index
    %c0_48 = arith.constant 0 : index
    %174 = vector.load %arg9[%c24_47, %c0_48] : memref<64x128xf32, #tpu.memory_space<vmem>>, vector<8x128xf32>
    tpu.vector_store %arg9[%c24_47, %c0_48], %173 {strides = array<i32>} : memref<64x128xf32, #tpu.memory_space<vmem>>, vector<8x128xf32>,
    %c32 = arith.constant 32 : index
    %c0_49 = arith.constant 0 : index
    %175 = vector.load %arg8[%c32, %c0_49] : memref<64x384xf32, #tpu.memory_space<vmem>>, vector<8x384xf32>
    %cst_50 = arith.constant dense<0.000000e+00> : vector<8x384xf32>
    %176 = tpu.matmul %169, %3, %cst_50 {dimension_numbers = #tpu.dot_dimension_numbers<[1], [0], [0], [1], [0, 0, 1, 1], [], []>} : vector<8x128xf32>, vector<128x384xf32>, vector<8x384xf32> -> vector<8x384xf32>
    %177 = vector.extract_strided_slice %175 {offsets = [0, 0], sizes = [8, 128], strides = [1, 1]} : vector<8x384xf32> to vector<8x128xf32>
    %178 = vector.extract_strided_slice %176 {offsets = [0, 0], sizes = [8, 128], strides = [1, 1]} : vector<8x384xf32> to vector<8x128xf32>
    %179 = arith.addf %177, %178 : vector<8x128xf32>
    %180 = arith.negf %179 : vector<8x128xf32>
    %181 = math.exp %180 : vector<8x128xf32>
    %cst_51 = arith.constant 1.000000e+00 : f32
    %182 = vector.broadcast %cst_51 : f32 to vector<8x128xf32>
    %183 = arith.addf %182, %181 : vector<8x128xf32>
    %184 = arith.divf %182, %183 : vector<8x128xf32>
    %185 = vector.extract_strided_slice %175 {offsets = [0, 128], sizes = [8, 128], strides = [1, 1]} : vector<8x384xf32> to vector<8x128xf32>
    %186 = vector.extract_strided_slice %176 {offsets = [0, 128], sizes = [8, 128], strides = [1, 1]} : vector<8x384xf32> to vector<8x128xf32>
    %187 = arith.addf %185, %186 : vector<8x128xf32>
    %188 = arith.negf %187 : vector<8x128xf32>
    %189 = math.exp %188 : vector<8x128xf32>
    %cst_52 = arith.constant 1.000000e+00 : f32
    %190 = vector.broadcast %cst_52 : f32 to vector<8x128xf32>
    %191 = arith.addf %190, %189 : vector<8x128xf32>
    %192 = arith.divf %190, %191 : vector<8x128xf32>
    %193 = vector.extract_strided_slice %175 {offsets = [0, 256], sizes = [8, 128], strides = [1, 1]} : vector<8x384xf32> to vector<8x128xf32>
    %194 = vector.extract_strided_slice %176 {offsets = [0, 256], sizes = [8, 128], strides = [1, 1]} : vector<8x384xf32> to vector<8x128xf32>
    %195 = vector.broadcast %4 : vector<1x128xf32> to vector<8x128xf32>
    %196 = arith.addf %194, %195 : vector<8x128xf32>
    %197 = arith.mulf %184, %196 : vector<8x128xf32>
    %198 = arith.addf %193, %197 : vector<8x128xf32>
    %199 = math.tanh %198 : vector<8x128xf32>
    %cst_53 = arith.constant 1.000000e+00 : f32
    %200 = vector.broadcast %cst_53 : f32 to vector<8x128xf32>
    %201 = arith.subf %200, %192 : vector<8x128xf32>
    %202 = arith.mulf %201, %199 : vector<8x128xf32>
    %203 = arith.mulf %192, %169 : vector<8x128xf32>
    %204 = arith.addf %202, %203 : vector<8x128xf32>
    %c4_i32 = arith.constant 4 : i32
    %205 = vector.broadcast %c4_i32 : i32 to vector<8x1xi32>
    %206 = arith.cmpi sgt, %1, %205 : vector<8x1xi32>
    %207 = vector.shape_cast %206 : vector<8x1xi1> to vector<8x1xi1>
    %208 = vector.broadcast %207 : vector<8x1xi1> to vector<8x128xi1>
    %209 = arith.select %208, %204, %169 : vector<8x128xi1>, vector<8x128xf32>
    %cst_54 = arith.constant 0.000000e+00 : f32
    %210 = vector.shape_cast %206 : vector<8x1xi1> to vector<8x1xi1>
    %211 = vector.broadcast %210 : vector<8x1xi1> to vector<8x128xi1>
    %212 = vector.broadcast %cst_54 : f32 to vector<8x128xf32>
    %213 = arith.select %211, %204, %212 : vector<8x128xi1>, vector<8x128xf32>
    %c32_55 = arith.constant 32 : index
    %c0_56 = arith.constant 0 : index
    %214 = vector.load %arg9[%c32_55, %c0_56] : memref<64x128xf32, #tpu.memory_space<vmem>>, vector<8x128xf32>
    tpu.vector_store %arg9[%c32_55, %c0_56], %213 {strides = array<i32>} : memref<64x128xf32, #tpu.memory_space<vmem>>, vector<8x128xf32>,
    %c40 = arith.constant 40 : index
    %c0_57 = arith.constant 0 : index
    %215 = vector.load %arg8[%c40, %c0_57] : memref<64x384xf32, #tpu.memory_space<vmem>>, vector<8x384xf32>
    %cst_58 = arith.constant dense<0.000000e+00> : vector<8x384xf32>
    %216 = tpu.matmul %209, %3, %cst_58 {dimension_numbers = #tpu.dot_dimension_numbers<[1], [0], [0], [1], [0, 0, 1, 1], [], []>} : vector<8x128xf32>, vector<128x384xf32>, vector<8x384xf32> -> vector<8x384xf32>
    %217 = vector.extract_strided_slice %215 {offsets = [0, 0], sizes = [8, 128], strides = [1, 1]} : vector<8x384xf32> to vector<8x128xf32>
    %218 = vector.extract_strided_slice %216 {offsets = [0, 0], sizes = [8, 128], strides = [1, 1]} : vector<8x384xf32> to vector<8x128xf32>
    %219 = arith.addf %217, %218 : vector<8x128xf32>
    %220 = arith.negf %219 : vector<8x128xf32>
    %221 = math.exp %220 : vector<8x128xf32>
    %cst_59 = arith.constant 1.000000e+00 : f32
    %222 = vector.broadcast %cst_59 : f32 to vector<8x128xf32>
    %223 = arith.addf %222, %221 : vector<8x128xf32>
    %224 = arith.divf %222, %223 : vector<8x128xf32>
    %225 = vector.extract_strided_slice %215 {offsets = [0, 128], sizes = [8, 128], strides = [1, 1]} : vector<8x384xf32> to vector<8x128xf32>
    %226 = vector.extract_strided_slice %216 {offsets = [0, 128], sizes = [8, 128], strides = [1, 1]} : vector<8x384xf32> to vector<8x128xf32>
    %227 = arith.addf %225, %226 : vector<8x128xf32>
    %228 = arith.negf %227 : vector<8x128xf32>
    %229 = math.exp %228 : vector<8x128xf32>
    %cst_60 = arith.constant 1.000000e+00 : f32
    %230 = vector.broadcast %cst_60 : f32 to vector<8x128xf32>
    %231 = arith.addf %230, %229 : vector<8x128xf32>
    %232 = arith.divf %230, %231 : vector<8x128xf32>
    %233 = vector.extract_strided_slice %215 {offsets = [0, 256], sizes = [8, 128], strides = [1, 1]} : vector<8x384xf32> to vector<8x128xf32>
    %234 = vector.extract_strided_slice %216 {offsets = [0, 256], sizes = [8, 128], strides = [1, 1]} : vector<8x384xf32> to vector<8x128xf32>
    %235 = vector.broadcast %4 : vector<1x128xf32> to vector<8x128xf32>
    %236 = arith.addf %234, %235 : vector<8x128xf32>
    %237 = arith.mulf %224, %236 : vector<8x128xf32>
    %238 = arith.addf %233, %237 : vector<8x128xf32>
    %239 = math.tanh %238 : vector<8x128xf32>
    %cst_61 = arith.constant 1.000000e+00 : f32
    %240 = vector.broadcast %cst_61 : f32 to vector<8x128xf32>
    %241 = arith.subf %240, %232 : vector<8x128xf32>
    %242 = arith.mulf %241, %239 : vector<8x128xf32>
    %243 = arith.mulf %232, %209 : vector<8x128xf32>
    %244 = arith.addf %242, %243 : vector<8x128xf32>
    %c5_i32 = arith.constant 5 : i32
    %245 = vector.broadcast %c5_i32 : i32 to vector<8x1xi32>
    %246 = arith.cmpi sgt, %1, %245 : vector<8x1xi32>
    %247 = vector.shape_cast %246 : vector<8x1xi1> to vector<8x1xi1>
    %248 = vector.broadcast %247 : vector<8x1xi1> to vector<8x128xi1>
    %249 = arith.select %248, %244, %209 : vector<8x128xi1>, vector<8x128xf32>
    %cst_62 = arith.constant 0.000000e+00 : f32
    %250 = vector.shape_cast %246 : vector<8x1xi1> to vector<8x1xi1>
    %251 = vector.broadcast %250 : vector<8x1xi1> to vector<8x128xi1>
    %252 = vector.broadcast %cst_62 : f32 to vector<8x128xf32>
    %253 = arith.select %251, %244, %252 : vector<8x128xi1>, vector<8x128xf32>
    %c40_63 = arith.constant 40 : index
    %c0_64 = arith.constant 0 : index
    %254 = vector.load %arg9[%c40_63, %c0_64] : memref<64x128xf32, #tpu.memory_space<vmem>>, vector<8x128xf32>
    tpu.vector_store %arg9[%c40_63, %c0_64], %253 {strides = array<i32>} : memref<64x128xf32, #tpu.memory_space<vmem>>, vector<8x128xf32>,
    %c48 = arith.constant 48 : index
    %c0_65 = arith.constant 0 : index
    %255 = vector.load %arg8[%c48, %c0_65] : memref<64x384xf32, #tpu.memory_space<vmem>>, vector<8x384xf32>
    %cst_66 = arith.constant dense<0.000000e+00> : vector<8x384xf32>
    %256 = tpu.matmul %249, %3, %cst_66 {dimension_numbers = #tpu.dot_dimension_numbers<[1], [0], [0], [1], [0, 0, 1, 1], [], []>} : vector<8x128xf32>, vector<128x384xf32>, vector<8x384xf32> -> vector<8x384xf32>
    %257 = vector.extract_strided_slice %255 {offsets = [0, 0], sizes = [8, 128], strides = [1, 1]} : vector<8x384xf32> to vector<8x128xf32>
    %258 = vector.extract_strided_slice %256 {offsets = [0, 0], sizes = [8, 128], strides = [1, 1]} : vector<8x384xf32> to vector<8x128xf32>
    %259 = arith.addf %257, %258 : vector<8x128xf32>
    %260 = arith.negf %259 : vector<8x128xf32>
    %261 = math.exp %260 : vector<8x128xf32>
    %cst_67 = arith.constant 1.000000e+00 : f32
    %262 = vector.broadcast %cst_67 : f32 to vector<8x128xf32>
    %263 = arith.addf %262, %261 : vector<8x128xf32>
    %264 = arith.divf %262, %263 : vector<8x128xf32>
    %265 = vector.extract_strided_slice %255 {offsets = [0, 128], sizes = [8, 128], strides = [1, 1]} : vector<8x384xf32> to vector<8x128xf32>
    %266 = vector.extract_strided_slice %256 {offsets = [0, 128], sizes = [8, 128], strides = [1, 1]} : vector<8x384xf32> to vector<8x128xf32>
    %267 = arith.addf %265, %266 : vector<8x128xf32>
    %268 = arith.negf %267 : vector<8x128xf32>
    %269 = math.exp %268 : vector<8x128xf32>
    %cst_68 = arith.constant 1.000000e+00 : f32
    %270 = vector.broadcast %cst_68 : f32 to vector<8x128xf32>
    %271 = arith.addf %270, %269 : vector<8x128xf32>
    %272 = arith.divf %270, %271 : vector<8x128xf32>
    %273 = vector.extract_strided_slice %255 {offsets = [0, 256], sizes = [8, 128], strides = [1, 1]} : vector<8x384xf32> to vector<8x128xf32>
    %274 = vector.extract_strided_slice %256 {offsets = [0, 256], sizes = [8, 128], strides = [1, 1]} : vector<8x384xf32> to vector<8x128xf32>
    %275 = vector.broadcast %4 : vector<1x128xf32> to vector<8x128xf32>
    %276 = arith.addf %274, %275 : vector<8x128xf32>
    %277 = arith.mulf %264, %276 : vector<8x128xf32>
    %278 = arith.addf %273, %277 : vector<8x128xf32>
    %279 = math.tanh %278 : vector<8x128xf32>
    %cst_69 = arith.constant 1.000000e+00 : f32
    %280 = vector.broadcast %cst_69 : f32 to vector<8x128xf32>
    %281 = arith.subf %280, %272 : vector<8x128xf32>
    %282 = arith.mulf %281, %279 : vector<8x128xf32>
    %283 = arith.mulf %272, %249 : vector<8x128xf32>
    %284 = arith.addf %282, %283 : vector<8x128xf32>
    %c6_i32 = arith.constant 6 : i32
    %285 = vector.broadcast %c6_i32 : i32 to vector<8x1xi32>
    %286 = arith.cmpi sgt, %1, %285 : vector<8x1xi32>
    %287 = vector.shape_cast %286 : vector<8x1xi1> to vector<8x1xi1>
    %288 = vector.broadcast %287 : vector<8x1xi1> to vector<8x128xi1>
    %289 = arith.select %288, %284, %249 : vector<8x128xi1>, vector<8x128xf32>
    %cst_70 = arith.constant 0.000000e+00 : f32
    %290 = vector.shape_cast %286 : vector<8x1xi1> to vector<8x1xi1>
    %291 = vector.broadcast %290 : vector<8x1xi1> to vector<8x128xi1>
    %292 = vector.broadcast %cst_70 : f32 to vector<8x128xf32>
    %293 = arith.select %291, %284, %292 : vector<8x128xi1>, vector<8x128xf32>
    %c48_71 = arith.constant 48 : index
    %c0_72 = arith.constant 0 : index
    %294 = vector.load %arg9[%c48_71, %c0_72] : memref<64x128xf32, #tpu.memory_space<vmem>>, vector<8x128xf32>
    tpu.vector_store %arg9[%c48_71, %c0_72], %293 {strides = array<i32>} : memref<64x128xf32, #tpu.memory_space<vmem>>, vector<8x128xf32>,
    %c56 = arith.constant 56 : index
    %c0_73 = arith.constant 0 : index
    %295 = vector.load %arg8[%c56, %c0_73] : memref<64x384xf32, #tpu.memory_space<vmem>>, vector<8x384xf32>
    %cst_74 = arith.constant dense<0.000000e+00> : vector<8x384xf32>
    %296 = tpu.matmul %289, %3, %cst_74 {dimension_numbers = #tpu.dot_dimension_numbers<[1], [0], [0], [1], [0, 0, 1, 1], [], []>} : vector<8x128xf32>, vector<128x384xf32>, vector<8x384xf32> -> vector<8x384xf32>
    %297 = vector.extract_strided_slice %295 {offsets = [0, 0], sizes = [8, 128], strides = [1, 1]} : vector<8x384xf32> to vector<8x128xf32>
    %298 = vector.extract_strided_slice %296 {offsets = [0, 0], sizes = [8, 128], strides = [1, 1]} : vector<8x384xf32> to vector<8x128xf32>
    %299 = arith.addf %297, %298 : vector<8x128xf32>
    %300 = arith.negf %299 : vector<8x128xf32>
    %301 = math.exp %300 : vector<8x128xf32>
    %cst_75 = arith.constant 1.000000e+00 : f32
    %302 = vector.broadcast %cst_75 : f32 to vector<8x128xf32>
    %303 = arith.addf %302, %301 : vector<8x128xf32>
    %304 = arith.divf %302, %303 : vector<8x128xf32>
    %305 = vector.extract_strided_slice %295 {offsets = [0, 128], sizes = [8, 128], strides = [1, 1]} : vector<8x384xf32> to vector<8x128xf32>
    %306 = vector.extract_strided_slice %296 {offsets = [0, 128], sizes = [8, 128], strides = [1, 1]} : vector<8x384xf32> to vector<8x128xf32>
    %307 = arith.addf %305, %306 : vector<8x128xf32>
    %308 = arith.negf %307 : vector<8x128xf32>
    %309 = math.exp %308 : vector<8x128xf32>
    %cst_76 = arith.constant 1.000000e+00 : f32
    %310 = vector.broadcast %cst_76 : f32 to vector<8x128xf32>
    %311 = arith.addf %310, %309 : vector<8x128xf32>
    %312 = arith.divf %310, %311 : vector<8x128xf32>
    %313 = vector.extract_strided_slice %295 {offsets = [0, 256], sizes = [8, 128], strides = [1, 1]} : vector<8x384xf32> to vector<8x128xf32>
    %314 = vector.extract_strided_slice %296 {offsets = [0, 256], sizes = [8, 128], strides = [1, 1]} : vector<8x384xf32> to vector<8x128xf32>
    %315 = vector.broadcast %4 : vector<1x128xf32> to vector<8x128xf32>
    %316 = arith.addf %314, %315 : vector<8x128xf32>
    %317 = arith.mulf %304, %316 : vector<8x128xf32>
    %318 = arith.addf %313, %317 : vector<8x128xf32>
    %319 = math.tanh %318 : vector<8x128xf32>
    %cst_77 = arith.constant 1.000000e+00 : f32
    %320 = vector.broadcast %cst_77 : f32 to vector<8x128xf32>
    %321 = arith.subf %320, %312 : vector<8x128xf32>
    %322 = arith.mulf %321, %319 : vector<8x128xf32>
    %323 = arith.mulf %312, %289 : vector<8x128xf32>
    %324 = arith.addf %322, %323 : vector<8x128xf32>
    %c7_i32 = arith.constant 7 : i32
    %325 = vector.broadcast %c7_i32 : i32 to vector<8x1xi32>
    %326 = arith.cmpi sgt, %1, %325 : vector<8x1xi32>
    %cst_78 = arith.constant 0.000000e+00 : f32
    %327 = vector.shape_cast %326 : vector<8x1xi1> to vector<8x1xi1>
    %328 = vector.broadcast %327 : vector<8x1xi1> to vector<8x128xi1>
    %329 = vector.broadcast %cst_78 : f32 to vector<8x128xf32>
    %330 = arith.select %328, %324, %329 : vector<8x128xi1>, vector<8x128xf32>
    %c56_79 = arith.constant 56 : index
    %c0_80 = arith.constant 0 : index
    %331 = vector.load %arg9[%c56_79, %c0_80] : memref<64x128xf32, #tpu.memory_space<vmem>>, vector<8x128xf32>
    tpu.vector_store %arg9[%c56_79, %c0_80], %330 {strides = array<i32>} : memref<64x128xf32, #tpu.memory_space<vmem>>, vector<8x128xf32>,
    %c0_81 = arith.constant 0 : index
    %c0_82 = arith.constant 0 : index
    %332 = vector.load %arg9[%c0_81, %c0_82] : memref<64x128xf32, #tpu.memory_space<vmem>>, vector<64x128xf32>
    %cst_83 = arith.constant dense<0.000000e+00> : vector<64x128xf32>
    %333 = tpu.matmul %332, %5, %cst_83 {dimension_numbers = #tpu.dot_dimension_numbers<[1], [0], [0], [1], [0, 0, 1, 1], [], []>} : vector<64x128xf32>, vector<128x128xf32>, vector<64x128xf32> -> vector<64x128xf32>
    %334 = vector.broadcast %6 : vector<1x128xf32> to vector<64x128xf32>
    %335 = arith.addf %333, %334 : vector<64x128xf32>
    %cst_84 = arith.constant dense<0xFF800000> : vector<64xf32>
    %336 = vector.multi_reduction <maximumf>, %335, %cst_84 [1] : vector<64x128xf32> to vector<64xf32>
    %337 = vector.shape_cast %336 : vector<64xf32> to vector<64x1xf32>
    %338 = vector.broadcast %337 : vector<64x1xf32> to vector<64x128xf32>
    %339 = arith.subf %335, %338 : vector<64x128xf32>
    %340 = math.exp %339 : vector<64x128xf32>
    %cst_85 = arith.constant dense<0.000000e+00> : vector<64xf32>
    %341 = vector.multi_reduction <add>, %340, %cst_85 [1] : vector<64x128xf32> to vector<64xf32>
    %342 = vector.shape_cast %341 : vector<64xf32> to vector<64x1xf32>
    %343 = math.log %342 : vector<64x1xf32>
    %344 = arith.addf %343, %337 : vector<64x1xf32>
    %345 = vector.broadcast %344 : vector<64x1xf32> to vector<64x128xf32>
    %346 = arith.subf %335, %345 : vector<64x128xf32>
    %347 = vector.shape_cast %346 : vector<64x128xf32> to vector<8x8x128xf32>
    %c0_86 = arith.constant 0 : index
    %c0_87 = arith.constant 0 : index
    %c0_88 = arith.constant 0 : index
    %348 = vector.load %arg7[%c0_86, %c0_87, %c0_88] : memref<8x8x128xf32, #tpu.memory_space<vmem>>, vector<8x8x128xf32>
    tpu.vector_store %arg7[%c0_86, %c0_87, %c0_88], %347 {strides = array<i32>} : memref<8x8x128xf32, #tpu.memory_space<vmem>>, vector<8x8x128xf32>,
    return
  }
}

</mosaic_0001>

<bundles_post_ra>
// kernel: language_model_forward.1
= control target key start
LH: loop header
LB: loop body
LE: loop exit
PB: predicated region body
PF: predicated region fallthrough
CT: control target
= control target key end

     0   :  { %12 = vsyncpa [#allocation5], 0  ;;  %s4307_s0 = inlined_call_operand.vmem [shape: s32[64,1], index: 0, kind: input, shape index: {}]   ;;  %s4308_s1 = inlined_call_operand.vmem [shape: s32[8,1], index: 1, kind: input, shape index: {}]   ;;  %s4309_s2 = inlined_call_operand.hbm [shape: f32[128,384], index: 2, kind: input, shape index: {}]   ;;  %s4310_s3 = inlined_call_operand.hbm [shape: f32[128,384], index: 3, kind: input, shape index: {}]   ;;  %s4311_s4 = inlined_call_operand.vmem [shape: f32[1,128], index: 4, kind: input, shape index: {}]   ;;  %s4312_s5 = inlined_call_operand.hbm [shape: f32[128,128], index: 5, kind: input, shape index: {}]   ;;  %s4313_s6 = inlined_call_operand.vmem [shape: f32[1,128], index: 6, kind: input, shape index: {}]   ;;  %s4314_s7 = inlined_call_operand.vmem [shape: f32[8,8,128], index: 7, kind: output, shape index: {}]  }
   0x1   :  { %13 = vsyncpa [#allocation7], 0  ;;  %s3467_s24 = smov [#allocation6]   ;;  %s3468_s26 = smov [#allocation4]  }
   0x2   :  { %s35_s25 = sshll.u32 %s3467_s24, 4  ;;  %s23_s27 = sshll.u32 %s3468_s26, 4  ;;  %s36_s25 = int_to_ptr.vmem [resolvable:$true] %s35_s25  ;;  %s3519_s27 = int_to_ptr.vmem [resolvable:$true] %s23_s27 }
   0x3   :  { %s3397_s30 = scalar_lea.hbm %s4310_s3, 6144 }
   0x4   :  { %p3398_p0 = scmp.ne.s32.totalorder %s4310_s3, %s3397_s30  ;;  %p3401_p1 = scmp.lt.u32.totalorder %s3397_s30, %s4310_s3 }
   0x6   :  { %p3403_p2 = pnand %p3401_p1, %p3398_p0 }
   0x8   :  { %3406 = shalt.err (!%p3403_p2)
}
   0x9   :  { %s3407_s12 = scalar_lea.vmem %s36_s25, 6144  ;;  %p3412_p4 = scmp.lt.s32.totalorder %s36_s25, %s36_s25 }
   0xa   :  { %p3408_p3 = scmp.ne.s32.totalorder %s36_s25, %s3407_s12  ;;  %p3413_p5 = scmp.lt.s32.totalorder %s3407_s12, %s3407_s12 }
   0xc   :  { %p3414_p6 = por %p3413_p5, %p3412_p4 }
   0xe   :  { %p3415_p7 = pnand %p3414_p6, %p3408_p3 }
  0x10   :  { %3418 = shalt.err (!%p3415_p7)
}
  0x11   :  { %s3469_s13 = smov 384   ;;  %s3470_s14 = smov 24  }
  0x12   :  { %41 = dma.hbm_to_vmem [thread:$0]  %s4310_s3, 6144, %s36_s25, [#allocation7], %s3469_s13, %s3469_s13, %s3470_s14  }
  0x13   :  { %s3419_s19 = scalar_lea.hbm %s4309_s2, 6144 }
  0x14   :  { %p3420_p8 = scmp.ne.s32.totalorder %s4309_s2, %s3419_s19  ;;  %p3423_p9 = scmp.lt.u32.totalorder %s3419_s19, %s4309_s2 }
  0x16   :  { %p3425_p10 = pnand %p3423_p9, %p3420_p8 }
  0x18   :  { %3428 = shalt.err (!%p3425_p10)
}
  0x19   :  { %s3429_s24 = scalar_lea.vmem %s3519_s27, 6144  ;;  %p3434_p12 = scmp.lt.s32.totalorder %s3519_s27, %s3519_s27 }
  0x1a   :  { %p3430_p11 = scmp.ne.s32.totalorder %s3519_s27, %s3429_s24  ;;  %p3435_p13 = scmp.lt.s32.totalorder %s3429_s24, %s3429_s24 }
  0x1c   :  { %p3436_p0 = por %p3435_p13, %p3434_p12 }
  0x1e   :  { %p3437_p1 = pnand %p3436_p0, %p3430_p11 }
  0x20   :  { %3440 = shalt.err (!%p3437_p1)
}
  0x21   :  { %29 = dma.hbm_to_vmem [thread:$0]  %s4309_s2, 6144, %s3519_s27, [#allocation5], %s3469_s13, %s3469_s13, %s3470_s14  }
  0x22   :  { %s3471_s26 = smov [#allocation8]   ;;  %s3441_s8 = scalar_lea.hbm %s4312_s5, 2048 }
  0x23   :  { %s49_s28 = sshll.u32 %s3471_s26, 4  ;;  %p3442_p2 = scmp.ne.s32.totalorder %s4312_s5, %s3441_s8  ;;  %s50_s28 = int_to_ptr.vmem [resolvable:$true] %s49_s28 }
  0x24   :  { %p3445_p3 = scmp.lt.u32.totalorder %s3441_s8, %s4312_s5 }
  0x26   :  { %p3447_p4 = pnand %p3445_p3, %p3442_p2 }
  0x28   :  { %3450 = shalt.err (!%p3447_p4)
}
  0x29   :  { %s3451_s15 = scalar_lea.vmem %s50_s28, 2048  ;;  %p3456_p6 = scmp.lt.s32.totalorder %s50_s28, %s50_s28 }
  0x2a   :  { %p3452_p5 = scmp.ne.s32.totalorder %s50_s28, %s3451_s15  ;;  %p3457_p7 = scmp.lt.s32.totalorder %s3451_s15, %s3451_s15 }
  0x2c   :  { %p3458_p8 = por %p3457_p7, %p3456_p6 }
  0x2e   :  { %p3459_p9 = pnand %p3458_p8, %p3452_p5 }
  0x30   :  { %3462 = shalt.err (!%p3459_p9)
}
  0x31   :  { %s3472_s2 = smov 128   ;;  %s3473_s27 = smov 8  }
  0x32   :  { %55 = dma.hbm_to_vmem [thread:$0]  %s4312_s5, 2048, %s50_s28, [#allocation7], %s3472_s2, %s3472_s2, %s3473_s27  }
  0x33   :  { %3463 = dma.done.wait [#allocation5], 6144  }
  0x34   :  { %3464 = vsyncadd [#allocation5], 4294961152 }
  0x35   :  { %3465 = dma.done.wait [#allocation7], 8192  }
  0x36   :  { %3466 = vsyncadd [#allocation7], 4294959104  ;;  %v3474_v0 = vmov 0   ;;  %v69_v1 = vld [vmem:[%s4307_s0 + $0x10] sm:$0xff]  ;;  %v67_v2 = vld [vmem:[%s4307_s0] sm:$0xff]  ;;  %v4315_v5 = vmov 0.0  }
  0x37   :  { %3284 = vset.pattern.permute.xlu1 %v3474_v0  ;;  %3283 = vset.pattern.permute.xlu0 %v3474_v0  ;;  %v70_v3 = vld [vmem:[%s4307_s0 + $0x18] sm:$0xff]  ;;  %v68_v4 = vld [vmem:[%s4307_s0 + $0x8] sm:$0xff]  ;;  %v80_v8 = vld [vmem:[#allocation4 + $0x20] sm:$0xff] }
  0x38   :  { %199 = vperm.xlu1 %3284, %v69_v1   ;;  %193 = vperm.xlu0 %3283, %v67_v2   ;;  %v77_v6 = vld [vmem:[#allocation4 + $0x8] sm:$0xff]  ;;  %v76_v9 = vld [vmem:[#allocation4] sm:$0xff]  ;;  %v79_v10 = vld [vmem:[#allocation4 + $0x18] sm:$0xff] }
  0x39   :  { %304 = vmatprep.mubr.f32.mxu1 %v4315_v5  ;;  %549 = vmatprep.mubr.f32.mxu0 %v4315_v5  ;;  %v72_v7 = vld [vmem:[%s4307_s0 + $0x28] sm:$0xff]  ;;  %v71_v11 = vld [vmem:[%s4307_s0 + $0x20] sm:$0xff]  ;;  %v127_v16 = vld [vmem:[#allocation6 + $0x18] sm:$0xff]  ;;  %v2711_v17 = vpack.c.bf16 %v80_v8, %v77_v6  ;;  %v2713_v18 = vpack.c.bf16 %v79_v10, %v76_v9 }
  0x3a   :  { %v125_v12 = vld [vmem:[#allocation6 + $0x8] sm:$0xff]  ;;  %v128_v13 = vld [vmem:[#allocation6 + $0x20] sm:$0xff]  ;;  %v83_v21 = vld [vmem:[#allocation4 + $0x38] sm:$0xff] }
  0x3b   :  { %v3587_v14 = vld [vmem:[%s4308_s1] sm:$0xff]  ;;  %v3589_v19 = vpack.c.bf16 %v128_v13, %v125_v12  ;;  %v86_v22 = vld [vmem:[#allocation4 + $0x50] sm:$0xff]  ;;  %v85_v25 = vld [vmem:[#allocation4 + $0x48] sm:$0xff]  ;;  %2712 = vmatprep.subr.bf16.mxu1 %v2711_v17 }
  0x3c   :  { %202 = vperm.xlu1 %3284, %v70_v3   ;;  %196 = vperm.xlu0 %3283, %v68_v4   ;;  %v124_v15 = vld [vmem:[#allocation6] sm:$0xff]  ;;  %v82_v23 = vld [vmem:[#allocation4 + $0x30] sm:$0xff]  ;;  %v2715_v24 = vpack.c.bf16 %v86_v22, %v83_v21  ;;  %v131_v26 = vld [vmem:[#allocation6 + $0x38] sm:$0xff]  ;;  %vm828_vm0 = vcmp.gt.s32.totalorder %v3587_v14, 1  ;;  %vm654_vm1 = vcmp.gt.s32.totalorder %v3587_v14, 0  ;;  %vm1178_vm2 = vcmp.gt.s32.totalorder %v3587_v14, 3 }
  0x3d   :  { %v3591_v20 = vpack.c.bf16 %v127_v16, %v124_v15  ;;  %v134_v27 = vld [vmem:[#allocation6 + $0x50] sm:$0xff]  ;;  %v133_v30 = vld [vmem:[#allocation6 + $0x48] sm:$0xff]  ;;  %v74_v32 = vld [vmem:[%s4307_s0 + $0x38] sm:$0xff]  ;;  %2776 = vmatprep.subr.bf16.mxu0 %v3589_v19  ;;  %2714 = vmatpush1.bf16.msra.mxu1 %v2713_v18  ;;  %v2717_v35 = vpack.c.bf16 %v85_v25, %v82_v23  ;;  %v829_v48 = vsel %vm828_vm0, 1, %v3474_v0  ;;  %v655_v49 = vsel %vm654_vm1, 1, %v3474_v0 }
  0x3e   :  { %v3593_v28 = vpack.c.bf16 %v134_v27, %v131_v26  ;;  %v130_v29 = vld [vmem:[#allocation6 + $0x30] sm:$0xff]  ;;  %v89_v31 = vld [vmem:[#allocation4 + $0x68] sm:$0xff]  ;;  %v92_v34 = vld [vmem:[#allocation4 + $0x80] sm:$0xff]  ;;  %2716 = vmatprep.subr.bf16.mxu1 %v2715_v24  ;;  %vm1003_vm3 = vcmp.gt.s32.totalorder %v3587_v14, 2  ;;  %v1179_v63 = vsel %vm1178_vm2, 1, %v3474_v0  ;;  %vm1528_vm4 = vcmp.gt.s32.totalorder %v3587_v14, 5 }
  0x3f   :  { %v73_v33 = vld [vmem:[%s4307_s0 + $0x30] sm:$0xff]  ;;  %2778 = vmatpush1.bf16.msra.mxu0 %v3591_v20  ;;  %v3605_v36 = vpack.c.bf16 %v133_v30, %v130_v29  ;;  %v88_v37 = vld [vmem:[#allocation4 + $0x60] sm:$0xff]  ;;  %v137_v38 = vld [vmem:[#allocation6 + $0x68] sm:$0xff]  ;;  %v2719_v40 = vpack.c.bf16 %v92_v34, %v89_v31  ;;  %v1004_v1 = vsel %vm1003_vm3, 1, %v3474_v0  ;;  %vm1353_vm5 = vcmp.gt.s32.totalorder %v3587_v14, 4 }
  0x40   :  { %208 = vperm.xlu1 %3284, %v72_v7   ;;  %205 = vperm.xlu0 %3283, %v71_v11   ;;  %v140_v39 = vld [vmem:[#allocation6 + $0x80] sm:$0xff]  ;;  %v91_v41 = vld [vmem:[#allocation4 + $0x78] sm:$0xff]  ;;  %v98_v46 = vld [vmem:[#allocation4 + $0xb0] sm:$0xff]  ;;  %v1529_v16 = vsel %vm1528_vm4, 1, %v3474_v0  ;;  %v1354_v17 = vsel %vm1353_vm5, 1, %v3474_v0  ;;  %vm1878_vm6 = vcmp.gt.s32.totalorder %v3587_v14, 7 }
  0x41   :  { %2780 = vmatprep.subr.bf16.mxu0 %v3593_v28  ;;  %v3608_v42 = vpack.c.bf16 %v140_v39, %v137_v38  ;;  %v136_v43 = vld [vmem:[#allocation6 + $0x60] sm:$0xff]  ;;  %v139_v44 = vld [vmem:[#allocation6 + $0x78] sm:$0xff]  ;;  %v146_v50 = vld [vmem:[#allocation6 + $0xb0] sm:$0xff]  ;;  %2718 = vmatpush1.bf16.msra.mxu1 %v2717_v35  ;;  %v2721_v51 = vpack.c.bf16 %v91_v41, %v88_v37  ;;  %vm1703_vm7 = vcmp.gt.s32.totalorder %v3587_v14, 6  ;;  %vm3478_vm0 = vmmov 0  }
  0x42   :  { %v95_v45 = vld [vmem:[#allocation4 + $0x98] sm:$0xff]  ;;  %v3619_v52 = vpack.c.bf16 %v139_v44, %v136_v43  ;;  %v94_v53 = vld [vmem:[#allocation4 + $0x90] sm:$0xff]  ;;  %v97_v54 = vld [vmem:[#allocation4 + $0xa8] sm:$0xff]  ;;  %2720 = vmatprep.subr.bf16.mxu1 %v2719_v40  ;;  %v1704_v34 = vsel %vm1703_vm7, 1, %v3474_v0 }
  0x43   :  { %v143_v47 = vld [vmem:[#allocation6 + $0x98] sm:$0xff]  ;;  %2782 = vmatpush1.bf16.msra.mxu0 %v3605_v36  ;;  %v2723_v55 = vpack.c.bf16 %v98_v46, %v95_v45  ;;  %v142_v57 = vld [vmem:[#allocation6 + $0x90] sm:$0xff]  ;;  %v145_v58 = vld [vmem:[#allocation6 + $0xa8] sm:$0xff]  ;;  %v2725_v2 = vpack.c.bf16 %v97_v54, %v94_v53 }
  0x44   :  { %214 = vperm.xlu1 %3284, %v74_v32   ;;  %211 = vperm.xlu0 %3283, %v73_v33   ;;  %v3622_v56 = vpack.c.bf16 %v146_v50, %v143_v47  ;;  %v101_v59 = vld [vmem:[#allocation4 + $0xc8] sm:$0xff]  ;;  %v104_v60 = vld [vmem:[#allocation4 + $0xe0] sm:$0xff]  ;;  %v3633_v3 = vpack.c.bf16 %v145_v58, %v142_v57  ;;  %v103_v6 = vld [vmem:[#allocation4 + $0xd8] sm:$0xff]  ;;  %v1879_v33 = vsel %vm1878_vm6, 1, %v3474_v0 }
  0x45   :  { %2784 = vmatprep.subr.bf16.mxu0 %v3608_v42  ;;  %v149_v61 = vld [vmem:[#allocation6 + $0xc8] sm:$0xff]  ;;  %v152_v62 = vld [vmem:[#allocation6 + $0xe0] sm:$0xff]  ;;  %2722 = vmatpush1.bf16.msra.mxu1 %v2721_v51  ;;  %v2727_v7 = vpack.c.bf16 %v104_v60, %v101_v59  ;;  %v151_v10 = vld [vmem:[#allocation6 + $0xd8] sm:$0xff] }
  0x46   :  { %v100_v4 = vld [vmem:[#allocation4 + $0xc0] sm:$0xff]  ;;  %2724 = vmatprep.subr.bf16.mxu1 %v2723_v55  ;;  %v3636_v8 = vpack.c.bf16 %v152_v62, %v149_v61  ;;  %v107_v11 = vld [vmem:[#allocation4 + $0xf8] sm:$0xff]  ;;  %v110_v12 = vld [vmem:[#allocation4 + $0x110] sm:$0xff]  ;;  %v190_v62 = vlaneseq }
  0x47   :  { %2786 = vmatpush1.bf16.msra.mxu0 %v3619_v52  ;;  %v148_v9 = vld [vmem:[#allocation6 + $0xc0] sm:$0xff]  ;;  %v155_v13 = vld [vmem:[#allocation6 + $0xf8] sm:$0xff]  ;;  %v158_v15 = vld [vmem:[#allocation6 + $0x110] sm:$0xff]  ;;  %v2729_v18 = vpack.c.bf16 %v103_v6, %v100_v4  ;;  %v2731_v24 = vpack.c.bf16 %v110_v12, %v107_v11 }
  0x48   :  { %831 = vperm.xlu1 %3284, %v829_v48   ;;  %657 = vperm.xlu0 %3283, %v655_v49   ;;  %v3647_v21 = vpack.c.bf16 %v151_v10, %v148_v9  ;;  %v106_v22 = vld [vmem:[#allocation4 + $0xf0] sm:$0xff]  ;;  %v109_v23 = vld [vmem:[#allocation4 + $0x108] sm:$0xff]  ;;  %v3650_v25 = vpack.c.bf16 %v158_v15, %v155_v13  ;;  %v116_v30 = vld [vmem:[#allocation4 + $0x140] sm:$0xff]  ;;  %v3476_v10 = vmov 1.0  }
  0x49   :  { %2788 = vmatprep.subr.bf16.mxu0 %v3622_v56  ;;  %2726 = vmatpush1.bf16.msra.mxu1 %v2725_v2  ;;  %v154_v26 = vld [vmem:[#allocation6 + $0xf0] sm:$0xff]  ;;  %v157_v27 = vld [vmem:[#allocation6 + $0x108] sm:$0xff]  ;;  %v164_v32 = vld [vmem:[#allocation6 + $0x140] sm:$0xff]  ;;  %v2733_v35 = vpack.c.bf16 %v109_v23, %v106_v22 }
  0x4a   :  { %2728 = vmatprep.subr.bf16.mxu1 %v2727_v7  ;;  %v113_v29 = vld [vmem:[#allocation4 + $0x128] sm:$0xff]  ;;  %v3659_v37 = vpack.c.bf16 %v157_v27, %v154_v26  ;;  %v112_v38 = vld [vmem:[#allocation4 + $0x120] sm:$0xff]  ;;  %v115_v39 = vld [vmem:[#allocation4 + $0x138] sm:$0xff] }
  0x4b   :  { %2790 = vmatpush1.bf16.msra.mxu0 %v3633_v3  ;;  %v161_v31 = vld [vmem:[#allocation6 + $0x128] sm:$0xff]  ;;  %v2735_v40 = vpack.c.bf16 %v116_v30, %v113_v29  ;;  %v160_v43 = vld [vmem:[#allocation6 + $0x120] sm:$0xff]  ;;  %v163_v44 = vld [vmem:[#allocation6 + $0x138] sm:$0xff]  ;;  %v2737_v47 = vpack.c.bf16 %v115_v39, %v112_v38 }
  0x4c   :  { %1181 = vperm.xlu1 %3284, %v1179_v63   ;;  %1006 = vperm.xlu0 %3283, %v1004_v1   ;;  %v3662_v41 = vpack.c.bf16 %v164_v32, %v161_v31  ;;  %v119_v45 = vld [vmem:[#allocation4 + $0x158] sm:$0xff]  ;;  %v122_v0 = vld [vmem:[#allocation4 + $0x170] sm:$0xff]  ;;  %v3665_v48 = vpack.c.bf16 %v163_v44, %v160_v43  ;;  %v121_v51 = vld [vmem:[#allocation4 + $0x168] sm:$0xff]  ;;  %v3694_v63 = vand.u32 127, %v190_v62 }
  0x4d   :  { %2792 = vmatprep.subr.bf16.mxu0 %v3636_v8  ;;  %2730 = vmatpush1.bf16.msra.mxu1 %v2729_v18  ;;  %v167_v14 = vld [vmem:[#allocation6 + $0x158] sm:$0xff]  ;;  %v170_v46 = vld [vmem:[#allocation6 + $0x170] sm:$0xff]  ;;  %v2739_v50 = vpack.c.bf16 %v122_v0, %v119_v45  ;;  %v169_v55 = vld [vmem:[#allocation6 + $0x168] sm:$0xff] }
  0x4e   :  { %2732 = vmatprep.subr.bf16.mxu1 %v2731_v24  ;;  %v118_v49 = vld [vmem:[#allocation4 + $0x150] sm:$0xff]  ;;  %v3668_v53 = vpack.c.bf16 %v170_v46, %v167_v14  ;;  %v81_v58 = vld [vmem:[#allocation4 + $0x28] sm:$0xff]  ;;  %v84_v1 = vld [vmem:[#allocation4 + $0x40] sm:$0xff]  ;;  %v4317_v14 = vmov 0.0|0.0  }
  0x4f   :  { %2794 = vmatpush1.bf16.msra.mxu0 %v3647_v21  ;;  %v166_v54 = vld [vmem:[#allocation6 + $0x150] sm:$0xff]  ;;  %v2741_v59 = vpack.c.bf16 %v121_v51, %v118_v49  ;;  %v87_v2 = vld [vmem:[#allocation4 + $0x58] sm:$0xff]  ;;  %v93_v9 = vld [vmem:[#allocation4 + $0x88] sm:$0xff] }
  0x50   :  { %1531 = vperm.xlu1 %3284, %v1529_v16   ;;  %1356 = vperm.xlu0 %3283, %v1354_v17   ;;  %v78_v57 = vld [vmem:[#allocation4 + $0x10] sm:$0xff]  ;;  %v3671_v60 = vpack.c.bf16 %v169_v55, %v166_v54  ;;  %v2747_v6 = vpack.c.bf16 %v87_v2, %v84_v1  ;;  %v96_v13 = vld [vmem:[#allocation4 + $0xa0] sm:$0xff]  ;;  %v99_v15 = vld [vmem:[#allocation4 + $0xb8] sm:$0xff] }
  0x51   :  { %2796 = vmatprep.subr.bf16.mxu0 %v3650_v25  ;;  %2734 = vmatpush1.bf16.msra.mxu1 %v2733_v35  ;;  %v2743_v61 = vpack.c.bf16 %v81_v58, %v78_v57  ;;  %v90_v7 = vld [vmem:[#allocation4 + $0x70] sm:$0xff]  ;;  %v2755_v17 = vpack.c.bf16 %v99_v15, %v96_v13  ;;  %v105_v22 = vld [vmem:[#allocation4 + $0xe8] sm:$0xff]  ;;  %v108_v26 = vld [vmem:[#allocation4 + $0x100] sm:$0xff] }
  0x52   :  { %2736 = vmatprep.subr.bf16.mxu1 %v2735_v40  ;;  %v2751_v12 = vpack.c.bf16 %v93_v9, %v90_v7  ;;  %v102_v18 = vld [vmem:[#allocation4 + $0xd0] sm:$0xff]  ;;  %v111_v27 = vld [vmem:[#allocation4 + $0x118] sm:$0xff]  ;;  %v117_v32 = vld [vmem:[#allocation4 + $0x148] sm:$0xff] }
  0x53   :  { %2798 = vmatpush1.bf16.msra.mxu0 %v3659_v37  ;;  %v2759_v24 = vpack.c.bf16 %v105_v22, %v102_v18  ;;  %v2763_v30 = vpack.c.bf16 %v111_v27, %v108_v26  ;;  %v114_v31 = vld [vmem:[#allocation4 + $0x130] sm:$0xff]  ;;  %v120_v35 = vld [vmem:[#allocation4 + $0x160] sm:$0xff]  ;;  %v123_v38 = vld [vmem:[#allocation4 + $0x178] sm:$0xff] }
  0x54   :  { %1881 = vperm.xlu1 %3284, %v1879_v33   ;;  %1706 = vperm.xlu0 %3283, %v1704_v34   ;;  %v2767_v34 = vpack.c.bf16 %v117_v32, %v114_v31  ;;  %v2771_v40 = vpack.c.bf16 %v123_v38, %v120_v35  ;;  %v126_v44 = vld [vmem:[#allocation6 + $0x10] sm:$0xff]  ;;  %v129_v45 = vld [vmem:[#allocation6 + $0x28] sm:$0xff]  ;;  %v132_v46 = vld [vmem:[#allocation6 + $0x40] sm:$0xff] }
  0x55   :  { %2800 = vmatprep.subr.bf16.mxu0 %v3662_v41  ;;  %2738 = vmatpush1.bf16.msra.mxu1 %v2737_v47  ;;  %v3747_v0 = vpack.c.bf16 %v129_v45, %v126_v44  ;;  %v135_v47 = vld [vmem:[#allocation6 + $0x58] sm:$0xff]  ;;  %v141_v51 = vld [vmem:[#allocation6 + $0x88] sm:$0xff]  ;;  %v144_v55 = vld [vmem:[#allocation6 + $0xa0] sm:$0xff] }
  0x56   :  { %2740 = vmatprep.subr.bf16.mxu1 %v2739_v50  ;;  %v3758_v49 = vpack.c.bf16 %v135_v47, %v132_v46  ;;  %v138_v50 = vld [vmem:[#allocation6 + $0x70] sm:$0xff]  ;;  %v147_v57 = vld [vmem:[#allocation6 + $0xb8] sm:$0xff]  ;;  %v156_v1 = vld [vmem:[#allocation6 + $0x100] sm:$0xff] }
  0x57   :  { %2802 = vmatpush1.bf16.msra.mxu0 %v3665_v48  ;;  %v3768_v54 = vpack.c.bf16 %v141_v51, %v138_v50  ;;  %v3778_v58 = vpack.c.bf16 %v147_v57, %v144_v55  ;;  %v159_v2 = vld [vmem:[#allocation6 + $0x118] sm:$0xff]  ;;  %v168_v9 = vld [vmem:[#allocation6 + $0x160] sm:$0xff] }
  0x58   :  { %2804 = vmatprep.subr.bf16.mxu0 %v3668_v53 }
  0x59   :  { %2742 = vmatpush1.bf16.msra.mxu1 %v2741_v59  ;;  %v150_v59 = vld [vmem:[#allocation6 + $0xd0] sm:$0xff] }
  0x5a   :  { %2744 = vmatprep.subr.bf16.mxu1 %v2743_v61 }
  0x5b   :  { %2806 = vmatpush1.bf16.msra.mxu0 %v3671_v60 }
  0x5c   :  { %2832 = vmatprep.subr.bf16.mxu0 %v3589_v19 }
  0x5e   :  { %550 = vmatmul.mubr.f32.vlgmr.msra.gmra.mrb[0].mxu0 %v4315_v5 }
  0x5f   :  { %2834 = vmatpush1.bf16.msra.mxu0 %v3591_v20  ;;  %729 = vmatprep.mubr.f32.mxu0 %v4315_v5 }
  0x60   :  { %2836 = vmatprep.subr.bf16.mxu0 %v3593_v28 }
  0x63   :  { %2838 = vmatpush1.bf16.msra.mxu0 %v3605_v36 }
  0x64   :  { %2840 = vmatprep.subr.bf16.mxu0 %v3608_v42 }
  0x67   :  { %2842 = vmatpush1.bf16.msra.mxu0 %v3619_v52 }
  0x68   :  { %2844 = vmatprep.subr.bf16.mxu0 %v3622_v56 }
  0x6b   :  { %2846 = vmatpush1.bf16.msra.mxu0 %v3633_v3 }
  0x6c   :  { %2848 = vmatprep.subr.bf16.mxu0 %v3636_v8 }
  0x6f   :  { %2850 = vmatpush1.bf16.msra.mxu0 %v3647_v21 }
  0x70   :  { %2852 = vmatprep.subr.bf16.mxu0 %v3650_v25 }
  0x73   :  { %2854 = vmatpush1.bf16.msra.mxu0 %v3659_v37 }
  0x74   :  { %2856 = vmatprep.subr.bf16.mxu0 %v3662_v41 }
  0x77   :  { %2858 = vmatpush1.bf16.msra.mxu0 %v3665_v48 }
  0x78   :  { %2860 = vmatprep.subr.bf16.mxu0 %v3668_v53 }
  0x7b   :  { %2862 = vmatpush1.bf16.msra.mxu0 %v3671_v60 }
  0x7c   :  { %2888 = vmatprep.subr.bf16.mxu0 %v3589_v19 }
  0xb7   :  { %v3696_v4 = vpop.permute.xlu0 %193  ;;  %v200_v16 = vpop.permute.xlu1 %199 }
  0xb8   :  { %vm216_vm8 = vcmp.eq.s32.totalorder %v3694_v63, %v3696_v4  ;;  %vm218_vm10 = vcmp.eq.s32.totalorder %v3694_v63, %v200_v16  ;;  %v3791_v4 = vpack.c.bf16 %v159_v2, %v156_v1  ;;  %v3868_v2 = vld [vmem:[%s4311_s4] ss:$0 sm:$0xff] }
  0xb9   :  { %2115 = vmatmul.mubr.msk.f32.vlgmr.msra.gmra.mrb[0].mxu1 %vm216_vm8, %v3476_v10 }
  0xba   :  { %2746 = vmatpush3.bf16.msra.mxu1 %v2743_v61  ;;  %310 = vmatprep.mubr.f32.mxu1 %v4315_v5  ;;  %v153_v61 = vld [vmem:[#allocation6 + $0xe8] sm:$0xff] }
  0xbb   :  { %v3705_v11 = vpop.permute.xlu0 %196  ;;  %2748 = vmatprep.subr.bf16.mxu1 %v2747_v6  ;;  %v203_v23 = vpop.permute.xlu1 %202  ;;  %v3785_v62 = vpack.c.bf16 %v153_v61, %v150_v59 }
  0xbc   :  { %vm217_vm9 = vcmp.eq.s32.totalorder %v3694_v63, %v3705_v11  ;;  %vm219_vm11 = vcmp.eq.s32.totalorder %v3694_v63, %v203_v23 }
  0xbd   :  { %2116 = vmatmul.mubr.msk.f32.gmra.mrb[2].mxu1 %vm217_vm9, %v3476_v10 }
  0xbe   :  { %2750 = vmatpush3.bf16.msra.mxu1 %v2747_v6  ;;  %316 = vmatprep.mubr.f32.mxu1 %v4315_v5  ;;  %v165_v6 = vld [vmem:[#allocation6 + $0x148] sm:$0xff] }
  0xbf   :  { %2752 = vmatprep.subr.bf16.mxu1 %v2751_v12  ;;  %v206_v29 = vpop.permute.xlu0 %205  ;;  %v209_v33 = vpop.permute.xlu1 %208 }
  0xc0   :  { %vm220_vm12 = vcmp.eq.s32.totalorder %v3694_v63, %v206_v29  ;;  %vm221_vm13 = vcmp.eq.s32.totalorder %v3694_v63, %v209_v33 }
  0xc1   :  { %2117 = vmatmul.mubr.msk.f32.gmra.mrb[4].mxu1 %vm218_vm10, %v3476_v10 }
  0xc2   :  { %2754 = vmatpush3.bf16.msra.mxu1 %v2751_v12  ;;  %322 = vmatprep.mubr.f32.mxu1 %v4315_v5 }
  0xc3   :  { %2756 = vmatprep.subr.bf16.mxu1 %v2755_v17  ;;  %v212_v39 = vpop.permute.xlu0 %211  ;;  %v215_v43 = vpop.permute.xlu1 %214 }
  0xc4   :  { %vm222_vm14 = vcmp.eq.s32.totalorder %v3694_v63, %v212_v39  ;;  %vm223_vm15 = vcmp.eq.s32.totalorder %v3694_v63, %v215_v43  ;;  %v162_v63 = vld [vmem:[#allocation6 + $0x130] sm:$0xff] }
  0xc5   :  { %2118 = vmatmul.mubr.msk.f32.gmra.mrb[6].mxu1 %vm219_vm11, %v3476_v10  ;;  %v3795_v7 = vpack.c.bf16 %v165_v6, %v162_v63 }
  0xc6   :  { %2758 = vmatpush3.bf16.msra.mxu1 %v2755_v17  ;;  %328 = vmatprep.mubr.f32.mxu1 %v4315_v5 }
  0xc7   :  { %2760 = vmatprep.subr.bf16.mxu1 %v2759_v24 }
  0xc9   :  { %2119 = vmatmul.mubr.msk.f32.gmra.mrb[8].mxu1 %vm220_vm12, %v3476_v10 }
  0xca   :  { %2762 = vmatpush3.bf16.msra.mxu1 %v2759_v24  ;;  %334 = vmatprep.mubr.f32.mxu1 %v4315_v5 }
  0xcb   :  { %2764 = vmatprep.subr.bf16.mxu1 %v2763_v30 }
  0xcd   :  { %2120 = vmatmul.mubr.msk.f32.gmra.mrb[10].mxu1 %vm221_vm13, %v3476_v10 }
  0xce   :  { %2766 = vmatpush3.bf16.msra.mxu1 %v2763_v30  ;;  %340 = vmatprep.mubr.f32.mxu1 %v4315_v5 }
  0xcf   :  { %2768 = vmatprep.subr.bf16.mxu1 %v2767_v34 }
  0xd1   :  { %2121 = vmatmul.mubr.msk.f32.gmra.mrb[12].mxu1 %vm222_vm14, %v3476_v10 }
  0xd2   :  { %2770 = vmatpush3.bf16.msra.mxu1 %v2767_v34  ;;  %346 = vmatprep.mubr.f32.mxu1 %v4315_v5 }
  0xd3   :  { %2772 = vmatprep.subr.bf16.mxu1 %v2771_v40 }
  0xd5   :  { %2122 = vmatmul.mubr.msk.f32.gmra.mrb[14].mxu1 %vm223_vm15, %v3476_v10 }
  0xd6   :  { %2774 = vmatpush3.bf16.msra.mxu1 %v2771_v40  ;;  %2375 = vmatprep.mubr.msk.f32.mxu1 %vm216_vm8, %v3476_v10 }
  0xd7   :  { %2807 = vmatprep.subr.bf16.mxu1 %v4317_v14 }
  0xd9   :  { %2376 = vmatmul.mubr.msk.f32.vlgmr.msra.gmra.mrb[16].mxu1 %vm217_vm9, %v3476_v10 }
  0xda   :  { %2809 = vmatpush3.bf16.msra.mxu1 %v3747_v0  ;;  %2378 = vmatprep.mubr.msk.f32.mxu1 %vm218_vm10, %v3476_v10 }
  0xdb   :  { %2810 = vmatprep.subr.bf16.mxu1 %v4317_v14 }
  0xdd   :  { %2379 = vmatmul.mubr.msk.f32.gmra.mrb[18].mxu1 %vm219_vm11, %v3476_v10 }
  0xde   :  { %2812 = vmatpush3.bf16.msra.mxu1 %v3758_v49  ;;  %2381 = vmatprep.mubr.msk.f32.mxu1 %vm220_vm12, %v3476_v10 }
  0xdf   :  { %2813 = vmatprep.subr.bf16.mxu1 %v4317_v14 }
  0xe1   :  { %2382 = vmatmul.mubr.msk.f32.gmra.mrb[20].mxu1 %vm221_vm13, %v3476_v10 }
  0xe2   :  { %2815 = vmatpush3.bf16.msra.mxu1 %v3768_v54  ;;  %2384 = vmatprep.mubr.msk.f32.mxu1 %vm222_vm14, %v3476_v10 }
  0xe3   :  { %2816 = vmatprep.subr.bf16.mxu1 %v4317_v14 }
  0xe5   :  { %2385 = vmatmul.mubr.msk.f32.gmra.mrb[22].mxu1 %vm223_vm15, %v3476_v10  ;;  %v171_v10 = vld [vmem:[#allocation6 + $0x178] sm:$0xff] }
  0xe6   :  { %2818 = vmatpush3.bf16.msra.mxu1 %v3778_v58  ;;  %2419 = vmatprep.mubr.msk.f32.mxu1 %vm3478_vm0, %v4315_v5  ;;  %v3799_v11 = vpack.c.bf16 %v171_v10, %v168_v9 }
  0xe7   :  { %2819 = vmatprep.subr.bf16.mxu1 %v4317_v14 }
  0xea   :  { %2821 = vmatpush3.bf16.msra.mxu1 %v3785_v62 }
  0xeb   :  { %2822 = vmatprep.subr.bf16.mxu1 %v4317_v14 }
  0xee   :  { %2824 = vmatpush3.bf16.msra.mxu1 %v3791_v4 }
  0xef   :  { %2825 = vmatprep.subr.bf16.mxu1 %v4317_v14 }
  0xf2   :  { %2827 = vmatpush3.bf16.msra.mxu1 %v3795_v7 }
  0xf3   :  { %2828 = vmatprep.subr.bf16.mxu1 %v4317_v14 }
  0xf6   :  { %2830 = vmatpush3.bf16.msra.mxu1 %v3799_v11 }
  0xf7   :  { %2863 = vmatprep.subr.bf16.mxu1 %v4317_v14 }
  0xf9   :  { %2420 = vmatmul.mubr.f32.vlgmr.msra.gmra.mrb[24].mxu1 %v4315_v5 }
  0xfa   :  { %2865 = vmatpush3.bf16.msra.mxu1 %v3747_v0  ;;  %2454 = vmatprep.mubr.msk.f32.mxu1 %vm3478_vm0, %v4315_v5 }
  0xfb   :  { %2866 = vmatprep.subr.bf16.mxu1 %v4317_v14 }
  0xfe   :  { %2868 = vmatpush3.bf16.msra.mxu1 %v3758_v49 }
  0xff   :  { %2869 = vmatprep.subr.bf16.mxu1 %v4317_v14 }
 0x102   :  { %2871 = vmatpush3.bf16.msra.mxu1 %v3768_v54 }
 0x103   :  { %2872 = vmatprep.subr.bf16.mxu1 %v4317_v14 }
 0x106   :  { %2874 = vmatpush3.bf16.msra.mxu1 %v3778_v58 }
 0x107   :  { %2875 = vmatprep.subr.bf16.mxu1 %v4317_v14 }
 0x10a   :  { %2877 = vmatpush3.bf16.msra.mxu1 %v3785_v62 }
 0x10b   :  { %2878 = vmatprep.subr.bf16.mxu1 %v4317_v14 }
 0x10e   :  { %2880 = vmatpush3.bf16.msra.mxu1 %v3791_v4 }
 0x10f   :  { %2881 = vmatprep.subr.bf16.mxu1 %v4317_v14 }
 0x112   :  { %2883 = vmatpush3.bf16.msra.mxu1 %v3795_v7 }
 0x113   :  { %2884 = vmatprep.subr.bf16.mxu1 %v4317_v14 }
 0x116   :  { %2886 = vmatpush3.bf16.msra.mxu1 %v3799_v11 }
 0x117   :  { %2919 = vmatprep.subr.bf16.mxu1 %v4317_v14 }
 0x131   :  { %v551_v12 = vpop.f32.mrb[0].mxu0 }
 0x132   :  { %v553_v13 = vpop.f32.mrb[1].mxu0 }
 0x18c   :  { %v306_v15 = vpop.f32.mrb[0].mxu1 }
 0x18d   :  { %v626_v16 = vadd.f32 %v551_v12, %v306_v15  ;;  %v308_v17 = vpop.f32.mrb[1].mxu1 }
 0x18e   :  { %v633_v18 = vadd.f32 %v553_v13, %v308_v17 }
 0x18f   :  { %v2131_v44 = vmul.f32 -1.442695, %v626_v16 }
 0x190   :  { %v3823_v22 = vpop.f32.mrb[2].mxu1  ;;  %v2132_v57 = vmul.f32 -1.442695, %v633_v18 }
 0x191   :  { %v3825_v23 = vpop.f32.mrb[3].mxu1  ;;  %3285 = vpow2.f32 %v2131_v44  ;;  %v3871_v44 = vpop.permute.xlu0 %657 }
 0x192   :  { %3287 = vpow2.f32 %v2132_v57  ;;  %vm659_vm1 = vcmp.eq.s32.totalorder %v3871_v44, 1  ;;  %v186_v44 = vld [vmem:[#allocation8 + $0x68] sm:$0xff] }
 0x194   :  { %v3827_v24 = vpop.f32.mrb[4].mxu1 }
 0x195   :  { %v3829_v26 = vpop.f32.mrb[5].mxu1 }
 0x198   :  { %v3831_v27 = vpop.f32.mrb[6].mxu1 }
 0x199   :  { %v3833_v29 = vpop.f32.mrb[7].mxu1 }
 0x19b   :  { %v3286_v59 = vpop.eup %3285 }
 0x19c   :  { %v3835_v30 = vpop.f32.mrb[8].mxu1  ;;  %v630_v61 = vadd.f32 1.0, %v3286_v59  ;;  %v3288_v1 = vpop.eup %3287 }
 0x19d   :  { %v3837_v31 = vpop.f32.mrb[9].mxu1  ;;  %v637_v63 = vadd.f32 1.0, %v3288_v1 }
 0x19e   :  { %3289 = vrcp.f32 %v630_v61 }
 0x19f   :  { %3291 = vrcp.f32 %v637_v63 }
 0x1a0   :  { %v3839_v32 = vpop.f32.mrb[10].mxu1 }
 0x1a1   :  { %v3841_v33 = vpop.f32.mrb[11].mxu1 }
 0x1a4   :  { %v3843_v34 = vpop.f32.mrb[12].mxu1 }
 0x1a5   :  { %v3845_v35 = vpop.f32.mrb[13].mxu1 }
 0x1a8   :  { %v3847_v38 = vpop.f32.mrb[14].mxu1  ;;  %v3290_v12 = vpop.eup %3289 }
 0x1a9   :  { %v3849_v39 = vpop.f32.mrb[15].mxu1  ;;  %v3292_v16 = vpop.eup %3291 }
 0x1aa   :  { %v650_v17 = vsub.f32 1.0, %v3292_v16  ;;  %v652_v59 = vmul.f32 0.0, %v3292_v16 }
 0x1ac   :  { %v3851_v40 = vpop.f32.mrb[16].mxu1 }
 0x1ad   :  { %v419_v43 = vpop.f32.mrb[17].mxu1 }
 0x1b0   :  { %v3853_v45 = vpop.f32.mrb[18].mxu1 }
 0x1b1   :  { %v3855_v46 = vpop.f32.mrb[19].mxu1 }
 0x1b4   :  { %v3857_v47 = vpop.f32.mrb[20].mxu1 }
 0x1b5   :  { %v3859_v50 = vpop.f32.mrb[21].mxu1 }
 0x1b8   :  { %v3861_v51 = vpop.f32.mrb[22].mxu1 }
 0x1b9   :  { %v3863_v55 = vpop.f32.mrb[23].mxu1 }
 0x1cc   :  { %v622_v6 = vpop.f32.mrb[24].mxu1 }
 0x1cd   :  { %v646_v9 = vadd.f32 %v3868_v2, %v622_v6  ;;  %v2421_v10 = vpop.f32.mrb[25].mxu1 }
 0x1cf   :  { %v647_v13 = vmul.f32 %v3290_v12, %v646_v9 }
 0x1d1   :  { %v648_v15 = vadd.f32 %v647_v13, %v419_v43 }
 0x1d3   :  { %3293 = vtanh.f32 %v648_v15 }
 0x1dd   :  { %v3294_v18 = vpop.eup %3293 }
 0x1de   :  { %v651_v57 = vmul.f32 %v3294_v18, %v650_v17 }
 0x1e0   :  { %v3873_v61 = vadd.f32 %v652_v59, %v651_v57 }
 0x1e2   :  { %2134 = vmatmul.mubr.msk.f32.vlgmr.msra.gmra.mrb[2].mxu0 %vm659_vm1, %v3873_v61  ;;  %2455 = vmatmul.mubr.msk.f32.vlgmr.msra.gmra.mrb[26].mxu1 %vm659_vm1, %v3873_v61 }
 0x1e3   :  { %2890 = vmatpush1.bf16.msra.mxu0 %v3591_v20  ;;  %2921 = vmatpush3.bf16.msra.mxu1 %v3747_v0 }
 0x1e4   :  { %2892 = vmatprep.subr.bf16.mxu0 %v3593_v28  ;;  %2922 = vmatprep.subr.bf16.mxu1 %v4317_v14 }
 0x1e5   :  { %904 = vmatprep.mubr.f32.mxu0 %v4315_v5  ;;  %2489 = vmatprep.mubr.msk.f32.mxu1 %vm3478_vm0, %v4315_v5 }
 0x1e7   :  { %2894 = vmatpush1.bf16.msra.mxu0 %v3605_v36  ;;  %2924 = vmatpush3.bf16.msra.mxu1 %v3758_v49 }
 0x1e8   :  { %2896 = vmatprep.subr.bf16.mxu0 %v3608_v42  ;;  %2925 = vmatprep.subr.bf16.mxu1 %v4317_v14 }
 0x1eb   :  { %2898 = vmatpush1.bf16.msra.mxu0 %v3619_v52  ;;  %2927 = vmatpush3.bf16.msra.mxu1 %v3768_v54 }
 0x1ec   :  { %2900 = vmatprep.subr.bf16.mxu0 %v3622_v56  ;;  %2928 = vmatprep.subr.bf16.mxu1 %v4317_v14 }
 0x1ef   :  { %2902 = vmatpush1.bf16.msra.mxu0 %v3633_v3  ;;  %2930 = vmatpush3.bf16.msra.mxu1 %v3778_v58 }
 0x1f0   :  { %2904 = vmatprep.subr.bf16.mxu0 %v3636_v8  ;;  %2931 = vmatprep.subr.bf16.mxu1 %v4317_v14 }
 0x1f3   :  { %2906 = vmatpush1.bf16.msra.mxu0 %v3647_v21  ;;  %2933 = vmatpush3.bf16.msra.mxu1 %v3785_v62 }
 0x1f4   :  { %2908 = vmatprep.subr.bf16.mxu0 %v3650_v25  ;;  %2934 = vmatprep.subr.bf16.mxu1 %v4317_v14 }
 0x1f7   :  { %2910 = vmatpush1.bf16.msra.mxu0 %v3659_v37  ;;  %2936 = vmatpush3.bf16.msra.mxu1 %v3791_v4 }
 0x1f8   :  { %2912 = vmatprep.subr.bf16.mxu0 %v3662_v41  ;;  %2937 = vmatprep.subr.bf16.mxu1 %v4317_v14 }
 0x1fb   :  { %2914 = vmatpush1.bf16.msra.mxu0 %v3665_v48  ;;  %2939 = vmatpush3.bf16.msra.mxu1 %v3795_v7 }
 0x1fc   :  { %2916 = vmatprep.subr.bf16.mxu0 %v3668_v53  ;;  %2940 = vmatprep.subr.bf16.mxu1 %v4317_v14 }
 0x1ff   :  { %2918 = vmatpush1.bf16.msra.mxu0 %v3671_v60  ;;  %2942 = vmatpush3.bf16.msra.mxu1 %v3799_v11 }
 0x200   :  { %2944 = vmatprep.subr.bf16.mxu0 %v3589_v19  ;;  %2975 = vmatprep.subr.bf16.mxu1 %v4317_v14 }
 0x2b5   :  { %v731_v43 = vpop.f32.mrb[2].mxu0  ;;  %v802_v1 = vpop.f32.mrb[26].mxu1 }
 0x2b6   :  { %v806_v63 = vadd.f32 %v731_v43, %v3823_v22  ;;  %v733_v6 = vpop.f32.mrb[3].mxu0  ;;  %v2456_v9 = vpop.f32.mrb[27].mxu1  ;;  %v820_v57 = vadd.f32 %v3868_v2, %v802_v1 }
 0x2b7   :  { %v813_v10 = vadd.f32 %v733_v6, %v3825_v23  ;;  %v3924_v6 = vpop.permute.xlu1 %831 }
 0x2b8   :  { %v2136_v12 = vmul.f32 -1.442695, %v806_v63  ;;  %v660_v63 = vsel %vm659_vm1, %v3873_v61, 0.0  ;;  %vm833_vm2 = vcmp.eq.s32.totalorder %v3924_v6, 1 }
 0x2b9   :  { %v2137_v13 = vmul.f32 -1.442695, %v813_v10 }
 0x2ba   :  { %3295 = vpow2.f32 %v2136_v12 }
 0x2bb   :  { %3297 = vpow2.f32 %v2137_v13 }
 0x2c4   :  { %v3296_v15 = vpop.eup %3295 }
 0x2c5   :  { %v810_v16 = vadd.f32 1.0, %v3296_v15  ;;  %v3298_v17 = vpop.eup %3297 }
 0x2c6   :  { %v817_v18 = vadd.f32 1.0, %v3298_v17 }
 0x2c7   :  { %3299 = vrcp.f32 %v810_v16 }
 0x2c8   :  { %3301 = vrcp.f32 %v817_v18 }
 0x2d1   :  { %v3300_v59 = vpop.eup %3299 }
 0x2d2   :  { %v821_v5 = vmul.f32 %v3300_v59, %v820_v57  ;;  %v3302_v43 = vpop.eup %3301 }
 0x2d3   :  { %v824_v9 = vsub.f32 1.0, %v3302_v43  ;;  %v826_v12 = vmul.f32 %v3302_v43, %v660_v63 }
 0x2d4   :  { %v822_v22 = vadd.f32 %v3851_v40, %v821_v5  ;;  %v4319_v40 = vmov 0.0  }
 0x2d6   :  { %3303 = vtanh.f32 %v822_v22 }
 0x2e0   :  { %v3304_v23 = vpop.eup %3303 }
 0x2e1   :  { %v825_v10 = vmul.f32 %v3304_v23, %v824_v9 }
 0x2e3   :  { %v3926_v13 = vadd.f32 %v826_v12, %v825_v10 }
 0x2e5   :  { %v3932_v5 = vsel %vm833_vm2, %v3926_v13, %v660_v63 }
 0x2e6   :  { %905 = vmatmul.mubr.f32.vlgmr.msra.gmra.mrb[4].mxu0 %v3932_v5  ;;  %2490 = vmatmul.mubr.f32.vlgmr.msra.gmra.mrb[28].mxu1 %v3932_v5 }
 0x2e7   :  { %2946 = vmatpush1.bf16.msra.mxu0 %v3591_v20  ;;  %2977 = vmatpush3.bf16.msra.mxu1 %v3747_v0 }
 0x2e8   :  { %2948 = vmatprep.subr.bf16.mxu0 %v3593_v28  ;;  %2978 = vmatprep.subr.bf16.mxu1 %v4317_v14 }
 0x2e9   :  { %1079 = vmatprep.mubr.f32.mxu0 %v4319_v40  ;;  %2524 = vmatprep.mubr.msk.f32.mxu1 %vm3478_vm0, %v4319_v40 }
 0x2eb   :  { %2950 = vmatpush1.bf16.msra.mxu0 %v3605_v36  ;;  %2980 = vmatpush3.bf16.msra.mxu1 %v3758_v49 }
 0x2ec   :  { %2952 = vmatprep.subr.bf16.mxu0 %v3608_v42  ;;  %2981 = vmatprep.subr.bf16.mxu1 %v4317_v14 }
 0x2ef   :  { %2954 = vmatpush1.bf16.msra.mxu0 %v3619_v52  ;;  %2983 = vmatpush3.bf16.msra.mxu1 %v3768_v54 }
 0x2f0   :  { %2956 = vmatprep.subr.bf16.mxu0 %v3622_v56  ;;  %2984 = vmatprep.subr.bf16.mxu1 %v4317_v14 }
 0x2f3   :  { %2958 = vmatpush1.bf16.msra.mxu0 %v3633_v3  ;;  %2986 = vmatpush3.bf16.msra.mxu1 %v3778_v58 }
 0x2f4   :  { %2960 = vmatprep.subr.bf16.mxu0 %v3636_v8  ;;  %2987 = vmatprep.subr.bf16.mxu1 %v4317_v14 }
 0x2f7   :  { %2962 = vmatpush1.bf16.msra.mxu0 %v3647_v21  ;;  %2989 = vmatpush3.bf16.msra.mxu1 %v3785_v62 }
 0x2f8   :  { %2964 = vmatprep.subr.bf16.mxu0 %v3650_v25  ;;  %2990 = vmatprep.subr.bf16.mxu1 %v4317_v14 }
 0x2fb   :  { %2966 = vmatpush1.bf16.msra.mxu0 %v3659_v37  ;;  %2992 = vmatpush3.bf16.msra.mxu1 %v3791_v4 }
 0x2fc   :  { %2968 = vmatprep.subr.bf16.mxu0 %v3662_v41  ;;  %2993 = vmatprep.subr.bf16.mxu1 %v4317_v14 }
 0x2ff   :  { %2970 = vmatpush1.bf16.msra.mxu0 %v3665_v48  ;;  %2995 = vmatpush3.bf16.msra.mxu1 %v3795_v7 }
 0x300   :  { %2972 = vmatprep.subr.bf16.mxu0 %v3668_v53  ;;  %2996 = vmatprep.subr.bf16.mxu1 %v4317_v14 }
 0x303   :  { %2974 = vmatpush1.bf16.msra.mxu0 %v3671_v60  ;;  %2998 = vmatpush3.bf16.msra.mxu1 %v3799_v11 }
 0x304   :  { %3000 = vmatprep.subr.bf16.mxu0 %v3589_v19  ;;  %3031 = vmatprep.subr.bf16.mxu1 %v4317_v14 }
 0x3b9   :  { %v906_v1 = vpop.f32.mrb[4].mxu0  ;;  %v977_v15 = vpop.f32.mrb[28].mxu1 }
 0x3ba   :  { %v981_v16 = vadd.f32 %v906_v1, %v3827_v24  ;;  %v908_v17 = vpop.f32.mrb[5].mxu0  ;;  %v2491_v18 = vpop.f32.mrb[29].mxu1  ;;  %v995_v10 = vadd.f32 %v3868_v2, %v977_v15 }
 0x3bb   :  { %v988_v57 = vadd.f32 %v908_v17, %v3829_v26 }
 0x3bc   :  { %v2138_v59 = vmul.f32 -1.442695, %v981_v16  ;;  %v3975_v16 = vpop.permute.xlu0 %1006 }
 0x3bd   :  { %v2139_v22 = vmul.f32 -1.442695, %v988_v57  ;;  %vm1008_vm3 = vcmp.eq.s32.totalorder %v3975_v16, 1 }
 0x3be   :  { %3305 = vpow2.f32 %v2138_v59 }
 0x3bf   :  { %3307 = vpow2.f32 %v2139_v22 }
 0x3c8   :  { %v3306_v43 = vpop.eup %3305 }
 0x3c9   :  { %v985_v9 = vadd.f32 1.0, %v3306_v43  ;;  %v3308_v23 = vpop.eup %3307 }
 0x3ca   :  { %v992_v63 = vadd.f32 1.0, %v3308_v23 }
 0x3cb   :  { %3309 = vrcp.f32 %v985_v9 }
 0x3cc   :  { %3311 = vrcp.f32 %v992_v63 }
 0x3d5   :  { %v3310_v12 = vpop.eup %3309 }
 0x3d6   :  { %v996_v14 = vmul.f32 %v3310_v12, %v995_v10  ;;  %v3312_v1 = vpop.eup %3311 }
 0x3d7   :  { %v999_v18 = vsub.f32 1.0, %v3312_v1  ;;  %v1001_v57 = vmul.f32 %v3312_v1, %v3932_v5 }
 0x3d8   :  { %v997_v24 = vadd.f32 %v996_v14, %v3855_v46  ;;  %v4320_v14 = vmov 0.0|0.0  }
 0x3da   :  { %3313 = vtanh.f32 %v997_v24 }
 0x3e4   :  { %v3314_v26 = vpop.eup %3313 }
 0x3e5   :  { %v1000_v17 = vmul.f32 %v3314_v26, %v999_v18 }
 0x3e7   :  { %v3978_v59 = vadd.f32 %v1001_v57, %v1000_v17 }
 0x3e9   :  { %v3985_v15 = vsel %vm1008_vm3, %v3978_v59, %v3932_v5 }
 0x3ea   :  { %1080 = vmatmul.mubr.f32.vlgmr.msra.gmra.mrb[6].mxu0 %v3985_v15  ;;  %2525 = vmatmul.mubr.f32.vlgmr.msra.gmra.mrb[30].mxu1 %v3985_v15 }
 0x3eb   :  { %3002 = vmatpush1.bf16.msra.mxu0 %v3591_v20  ;;  %3033 = vmatpush3.bf16.msra.mxu1 %v3747_v0 }
 0x3ec   :  { %3004 = vmatprep.subr.bf16.mxu0 %v3593_v28  ;;  %3034 = vmatprep.subr.bf16.mxu1 %v4320_v14 }
 0x3ed   :  { %1254 = vmatprep.mubr.f32.mxu0 %v4319_v40  ;;  %2559 = vmatprep.mubr.msk.f32.mxu1 %vm3478_vm0, %v4319_v40 }
 0x3ef   :  { %3006 = vmatpush1.bf16.msra.mxu0 %v3605_v36  ;;  %3036 = vmatpush3.bf16.msra.mxu1 %v3758_v49 }
 0x3f0   :  { %3008 = vmatprep.subr.bf16.mxu0 %v3608_v42  ;;  %3037 = vmatprep.subr.bf16.mxu1 %v4320_v14 }
 0x3f3   :  { %3010 = vmatpush1.bf16.msra.mxu0 %v3619_v52  ;;  %3039 = vmatpush3.bf16.msra.mxu1 %v3768_v54 }
 0x3f4   :  { %3012 = vmatprep.subr.bf16.mxu0 %v3622_v56  ;;  %3040 = vmatprep.subr.bf16.mxu1 %v4320_v14 }
 0x3f7   :  { %3014 = vmatpush1.bf16.msra.mxu0 %v3633_v3  ;;  %3042 = vmatpush3.bf16.msra.mxu1 %v3778_v58 }
 0x3f8   :  { %3016 = vmatprep.subr.bf16.mxu0 %v3636_v8  ;;  %3043 = vmatprep.subr.bf16.mxu1 %v4320_v14 }
 0x3fb   :  { %3018 = vmatpush1.bf16.msra.mxu0 %v3647_v21  ;;  %3045 = vmatpush3.bf16.msra.mxu1 %v3785_v62 }
 0x3fc   :  { %3020 = vmatprep.subr.bf16.mxu0 %v3650_v25  ;;  %3046 = vmatprep.subr.bf16.mxu1 %v4320_v14 }
 0x3ff   :  { %3022 = vmatpush1.bf16.msra.mxu0 %v3659_v37  ;;  %3048 = vmatpush3.bf16.msra.mxu1 %v3791_v4 }
 0x400   :  { %3024 = vmatprep.subr.bf16.mxu0 %v3662_v41  ;;  %3049 = vmatprep.subr.bf16.mxu1 %v4320_v14 }
 0x403   :  { %3026 = vmatpush1.bf16.msra.mxu0 %v3665_v48  ;;  %3051 = vmatpush3.bf16.msra.mxu1 %v3795_v7 }
 0x404   :  { %3028 = vmatprep.subr.bf16.mxu0 %v3668_v53  ;;  %3052 = vmatprep.subr.bf16.mxu1 %v4320_v14 }
 0x407   :  { %3030 = vmatpush1.bf16.msra.mxu0 %v3671_v60  ;;  %3054 = vmatpush3.bf16.msra.mxu1 %v3799_v11 }
 0x408   :  { %3056 = vmatprep.subr.bf16.mxu0 %v3589_v19  ;;  %3087 = vmatprep.subr.bf16.mxu1 %v4320_v14 }
 0x4bd   :  { %v1081_v46 = vpop.f32.mrb[6].mxu0  ;;  %v1152_v5 = vpop.f32.mrb[30].mxu1 }
 0x4be   :  { %v1156_v22 = vadd.f32 %v1081_v46, %v3831_v27  ;;  %v1083_v43 = vpop.f32.mrb[7].mxu0  ;;  %v2526_v9 = vpop.f32.mrb[31].mxu1  ;;  %v1170_v26 = vadd.f32 %v3868_v2, %v1152_v5 }
 0x4bf   :  { %v1163_v23 = vadd.f32 %v1083_v43, %v3833_v29 }
 0x4c0   :  { %v2140_v63 = vmul.f32 -1.442695, %v1156_v22  ;;  %v4028_v22 = vpop.permute.xlu1 %1181 }
 0x4c1   :  { %v2141_v10 = vmul.f32 -1.442695, %v1163_v23  ;;  %vm1183_vm4 = vcmp.eq.s32.totalorder %v4028_v22, 1 }
 0x4c2   :  { %3315 = vpow2.f32 %v2140_v63 }
 0x4c3   :  { %3317 = vpow2.f32 %v2141_v10 }
 0x4cc   :  { %v3316_v12 = vpop.eup %3315 }
 0x4cd   :  { %v1160_v24 = vadd.f32 1.0, %v3316_v12  ;;  %v3318_v1 = vpop.eup %3317 }
 0x4ce   :  { %v1167_v18 = vadd.f32 1.0, %v3318_v1 }
 0x4cf   :  { %3319 = vrcp.f32 %v1160_v24 }
 0x4d0   :  { %3321 = vrcp.f32 %v1167_v18 }
 0x4d9   :  { %v3320_v17 = vpop.eup %3319 }
 0x4da   :  { %v1171_v57 = vmul.f32 %v3320_v17, %v1170_v26  ;;  %v3322_v46 = vpop.eup %3321 }
 0x4db   :  { %v1174_v9 = vsub.f32 1.0, %v3322_v46  ;;  %v1176_v23 = vmul.f32 %v3322_v46, %v3985_v15 }
 0x4dc   :  { %v1172_v27 = vadd.f32 %v3853_v45, %v1171_v57 }
 0x4de   :  { %3323 = vtanh.f32 %v1172_v27 }
 0x4e8   :  { %v3324_v29 = vpop.eup %3323 }
 0x4e9   :  { %v1175_v43 = vmul.f32 %v3324_v29, %v1174_v9 }
 0x4eb   :  { %v4031_v63 = vadd.f32 %v1176_v23, %v1175_v43 }
 0x4ed   :  { %v4038_v5 = vsel %vm1183_vm4, %v4031_v63, %v3985_v15 }
 0x4ee   :  { %1255 = vmatmul.mubr.f32.vlgmr.msra.gmra.mrb[8].mxu0 %v4038_v5  ;;  %2560 = vmatmul.mubr.f32.vlgmr.msra.gmra.mrb[32].mxu1 %v4038_v5 }
 0x4ef   :  { %3058 = vmatpush1.bf16.msra.mxu0 %v3591_v20  ;;  %3089 = vmatpush3.bf16.msra.mxu1 %v3747_v0 }
 0x4f0   :  { %3060 = vmatprep.subr.bf16.mxu0 %v3593_v28  ;;  %3090 = vmatprep.subr.bf16.mxu1 %v4320_v14 }
 0x4f1   :  { %1429 = vmatprep.mubr.f32.mxu0 %v4319_v40  ;;  %2594 = vmatprep.mubr.msk.f32.mxu1 %vm3478_vm0, %v4319_v40 }
 0x4f3   :  { %3062 = vmatpush1.bf16.msra.mxu0 %v3605_v36  ;;  %3092 = vmatpush3.bf16.msra.mxu1 %v3758_v49 }
 0x4f4   :  { %3064 = vmatprep.subr.bf16.mxu0 %v3608_v42  ;;  %3093 = vmatprep.subr.bf16.mxu1 %v4320_v14 }
 0x4f7   :  { %3066 = vmatpush1.bf16.msra.mxu0 %v3619_v52  ;;  %3095 = vmatpush3.bf16.msra.mxu1 %v3768_v54 }
 0x4f8   :  { %3068 = vmatprep.subr.bf16.mxu0 %v3622_v56  ;;  %3096 = vmatprep.subr.bf16.mxu1 %v4320_v14 }
 0x4fb   :  { %3070 = vmatpush1.bf16.msra.mxu0 %v3633_v3  ;;  %3098 = vmatpush3.bf16.msra.mxu1 %v3778_v58 }
 0x4fc   :  { %3072 = vmatprep.subr.bf16.mxu0 %v3636_v8  ;;  %3099 = vmatprep.subr.bf16.mxu1 %v4320_v14 }
 0x4ff   :  { %3074 = vmatpush1.bf16.msra.mxu0 %v3647_v21  ;;  %3101 = vmatpush3.bf16.msra.mxu1 %v3785_v62 }
 0x500   :  { %3076 = vmatprep.subr.bf16.mxu0 %v3650_v25  ;;  %3102 = vmatprep.subr.bf16.mxu1 %v4320_v14 }
 0x503   :  { %3078 = vmatpush1.bf16.msra.mxu0 %v3659_v37  ;;  %3104 = vmatpush3.bf16.msra.mxu1 %v3791_v4 }
 0x504   :  { %3080 = vmatprep.subr.bf16.mxu0 %v3662_v41  ;;  %3105 = vmatprep.subr.bf16.mxu1 %v4320_v14 }
 0x507   :  { %3082 = vmatpush1.bf16.msra.mxu0 %v3665_v48  ;;  %3107 = vmatpush3.bf16.msra.mxu1 %v3795_v7 }
 0x508   :  { %3084 = vmatprep.subr.bf16.mxu0 %v3668_v53  ;;  %3108 = vmatprep.subr.bf16.mxu1 %v4320_v14 }
 0x50b   :  { %3086 = vmatpush1.bf16.msra.mxu0 %v3671_v60  ;;  %3110 = vmatpush3.bf16.msra.mxu1 %v3799_v11 }
 0x50c   :  { %3112 = vmatprep.subr.bf16.mxu0 %v3589_v19  ;;  %3143 = vmatprep.subr.bf16.mxu1 %v4320_v14 }
 0x5c1   :  { %v1256_v45 = vpop.f32.mrb[8].mxu0  ;;  %v1327_v15 = vpop.f32.mrb[32].mxu1 }
 0x5c2   :  { %v1331_v10 = vadd.f32 %v1256_v45, %v3835_v30  ;;  %v1258_v12 = vpop.f32.mrb[9].mxu0  ;;  %v2561_v24 = vpop.f32.mrb[33].mxu1  ;;  %v1345_v9 = vadd.f32 %v3868_v2, %v1327_v15 }
 0x5c3   :  { %v1338_v1 = vadd.f32 %v1258_v12, %v3837_v31 }
 0x5c4   :  { %v2142_v18 = vmul.f32 -1.442695, %v1331_v10  ;;  %v4081_v10 = vpop.permute.xlu0 %1356 }
 0x5c5   :  { %v2143_v26 = vmul.f32 -1.442695, %v1338_v1  ;;  %vm1358_vm5 = vcmp.eq.s32.totalorder %v4081_v10, 1 }
 0x5c6   :  { %3325 = vpow2.f32 %v2142_v18 }
 0x5c7   :  { %3327 = vpow2.f32 %v2143_v26 }
 0x5d0   :  { %v3326_v17 = vpop.eup %3325 }
 0x5d1   :  { %v1335_v57 = vadd.f32 1.0, %v3326_v17  ;;  %v3328_v27 = vpop.eup %3327 }
 0x5d2   :  { %v1342_v46 = vadd.f32 1.0, %v3328_v27 }
 0x5d3   :  { %3329 = vrcp.f32 %v1335_v57 }
 0x5d4   :  { %3331 = vrcp.f32 %v1342_v46 }
 0x5dd   :  { %v3330_v29 = vpop.eup %3329 }
 0x5de   :  { %v1346_v43 = vmul.f32 %v3330_v29, %v1345_v9  ;;  %v3332_v23 = vpop.eup %3331 }
 0x5df   :  { %v1349_v45 = vsub.f32 1.0, %v3332_v23  ;;  %v1351_v24 = vmul.f32 %v3332_v23, %v4038_v5 }
 0x5e0   :  { %v1347_v30 = vadd.f32 %v1346_v43, %v3859_v50 }
 0x5e2   :  { %3333 = vtanh.f32 %v1347_v30 }
 0x5ec   :  { %v3334_v31 = vpop.eup %3333 }
 0x5ed   :  { %v1350_v12 = vmul.f32 %v3334_v31, %v1349_v45 }
 0x5ef   :  { %v4084_v1 = vadd.f32 %v1351_v24, %v1350_v12  ;;  %v4134_v24 = vpop.permute.xlu1 %1531 }
 0x5f0   :  { %vm1533_vm6 = vcmp.eq.s32.totalorder %v4134_v24, 1 }
 0x5f1   :  { %v4091_v15 = vsel %vm1358_vm5, %v4084_v1, %v4038_v5 }
 0x5f2   :  { %1430 = vmatmul.mubr.f32.vlgmr.msra.gmra.mrb[10].mxu0 %v4091_v15  ;;  %2595 = vmatmul.mubr.f32.vlgmr.msra.gmra.mrb[34].mxu1 %v4091_v15 }
 0x5f3   :  { %3114 = vmatpush1.bf16.msra.mxu0 %v3591_v20  ;;  %3145 = vmatpush3.bf16.msra.mxu1 %v3747_v0 }
 0x5f4   :  { %3116 = vmatprep.subr.bf16.mxu0 %v3593_v28  ;;  %3146 = vmatprep.subr.bf16.mxu1 %v4320_v14 }
 0x5f5   :  { %1604 = vmatprep.mubr.f32.mxu0 %v4319_v40  ;;  %2629 = vmatprep.mubr.msk.f32.mxu1 %vm3478_vm0, %v4319_v40 }
 0x5f7   :  { %3118 = vmatpush1.bf16.msra.mxu0 %v3605_v36  ;;  %3148 = vmatpush3.bf16.msra.mxu1 %v3758_v49 }
 0x5f8   :  { %3120 = vmatprep.subr.bf16.mxu0 %v3608_v42  ;;  %3149 = vmatprep.subr.bf16.mxu1 %v4320_v14 }
 0x5fb   :  { %3122 = vmatpush1.bf16.msra.mxu0 %v3619_v52  ;;  %3151 = vmatpush3.bf16.msra.mxu1 %v3768_v54 }
 0x5fc   :  { %3124 = vmatprep.subr.bf16.mxu0 %v3622_v56  ;;  %3152 = vmatprep.subr.bf16.mxu1 %v4320_v14 }
 0x5ff   :  { %3126 = vmatpush1.bf16.msra.mxu0 %v3633_v3  ;;  %3154 = vmatpush3.bf16.msra.mxu1 %v3778_v58 }
 0x600   :  { %3128 = vmatprep.subr.bf16.mxu0 %v3636_v8  ;;  %3155 = vmatprep.subr.bf16.mxu1 %v4320_v14 }
 0x603   :  { %3130 = vmatpush1.bf16.msra.mxu0 %v3647_v21  ;;  %3157 = vmatpush3.bf16.msra.mxu1 %v3785_v62 }
 0x604   :  { %3132 = vmatprep.subr.bf16.mxu0 %v3650_v25  ;;  %3158 = vmatprep.subr.bf16.mxu1 %v4320_v14 }
 0x607   :  { %3134 = vmatpush1.bf16.msra.mxu0 %v3659_v37  ;;  %3160 = vmatpush3.bf16.msra.mxu1 %v3791_v4 }
 0x608   :  { %3136 = vmatprep.subr.bf16.mxu0 %v3662_v41  ;;  %3161 = vmatprep.subr.bf16.mxu1 %v4320_v14 }
 0x60b   :  { %3138 = vmatpush1.bf16.msra.mxu0 %v3665_v48  ;;  %3163 = vmatpush3.bf16.msra.mxu1 %v3795_v7 }
 0x60c   :  { %3140 = vmatprep.subr.bf16.mxu0 %v3668_v53  ;;  %3164 = vmatprep.subr.bf16.mxu1 %v4320_v14 }
 0x60f   :  { %3142 = vmatpush1.bf16.msra.mxu0 %v3671_v60  ;;  %3166 = vmatpush3.bf16.msra.mxu1 %v3799_v11 }
 0x610   :  { %3168 = vmatprep.subr.bf16.mxu0 %v3589_v19  ;;  %3199 = vmatprep.subr.bf16.mxu1 %v4320_v14 }
 0x6c5   :  { %v1431_v50 = vpop.f32.mrb[10].mxu0  ;;  %v1502_v5 = vpop.f32.mrb[34].mxu1 }
 0x6c6   :  { %v1506_v18 = vadd.f32 %v1431_v50, %v3839_v32  ;;  %v1433_v26 = vpop.f32.mrb[11].mxu0  ;;  %v2596_v17 = vpop.f32.mrb[35].mxu1  ;;  %v1520_v19 = vadd.f32 %v3868_v2, %v1502_v5 }
 0x6c7   :  { %v1513_v57 = vadd.f32 %v1433_v26, %v3841_v33 }
 0x6c8   :  { %v2144_v27 = vmul.f32 -1.442695, %v1506_v18 }
 0x6c9   :  { %v2145_v46 = vmul.f32 -1.442695, %v1513_v57  ;;  %v177_v57 = vld [vmem:[#allocation8 + $0x20] sm:$0xff] }
 0x6ca   :  { %3335 = vpow2.f32 %v2144_v27  ;;  %v178_v27 = vld [vmem:[#allocation8 + $0x28] sm:$0xff] }
 0x6cb   :  { %3337 = vpow2.f32 %v2145_v46  ;;  %v179_v46 = vld [vmem:[#allocation8 + $0x30] sm:$0xff] }
 0x6d4   :  { %v3336_v9 = vpop.eup %3335 }
 0x6d5   :  { %v1510_v29 = vadd.f32 1.0, %v3336_v9  ;;  %v3338_v43 = vpop.eup %3337  ;;  %v180_v9 = vld [vmem:[#allocation8 + $0x38] sm:$0xff] }
 0x6d6   :  { %v1517_v30 = vadd.f32 1.0, %v3338_v43  ;;  %v181_v43 = vld [vmem:[#allocation8 + $0x40] sm:$0xff] }
 0x6d7   :  { %3339 = vrcp.f32 %v1510_v29  ;;  %v3235_v29 = vpack.c.bf16 %v180_v9, %v179_v46 }
 0x6d8   :  { %3341 = vrcp.f32 %v1517_v30  ;;  %v182_v30 = vld [vmem:[#allocation8 + $0x48] sm:$0xff] }
 0x6e1   :  { %v3340_v23 = vpop.eup %3339 }
 0x6e2   :  { %v1521_v45 = vmul.f32 %v3340_v23, %v1520_v19  ;;  %v3342_v31 = vpop.eup %3341  ;;  %v3239_v19 = vpack.c.bf16 %v182_v30, %v181_v43  ;;  %v183_v23 = vld [vmem:[#allocation8 + $0x50] sm:$0xff] }
 0x6e3   :  { %v1524_v12 = vsub.f32 1.0, %v3342_v31  ;;  %v1526_v18 = vmul.f32 %v3342_v31, %v4091_v15  ;;  %v185_v31 = vld [vmem:[#allocation8 + $0x60] sm:$0xff] }
 0x6e4   :  { %v1522_v32 = vadd.f32 %v3857_v47, %v1521_v45  ;;  %v175_v47 = vld [vmem:[#allocation8 + $0x10] sm:$0xff]  ;;  %v184_v45 = vld [vmem:[#allocation8 + $0x58] sm:$0xff] }
 0x6e6   :  { %3343 = vtanh.f32 %v1522_v32  ;;  %v3243_v32 = vpack.c.bf16 %v184_v45, %v183_v23 }
 0x6f0   :  { %v3344_v33 = vpop.eup %3343 }
 0x6f1   :  { %v1525_v50 = vmul.f32 %v3344_v33, %v1524_v12  ;;  %v187_v12 = vld [vmem:[#allocation8 + $0x70] sm:$0xff]  ;;  %v188_v33 = vld [vmem:[#allocation8 + $0x78] sm:$0xff] }
 0x6f3   :  { %v4137_v26 = vadd.f32 %v1526_v18, %v1525_v50  ;;  %v3251_v50 = vpack.c.bf16 %v188_v33, %v187_v12 }
 0x6f5   :  { %v4144_v5 = vsel %vm1533_vm6, %v4137_v26, %v4091_v15 }
 0x6f6   :  { %1605 = vmatmul.mubr.f32.vlgmr.msra.gmra.mrb[12].mxu0 %v4144_v5  ;;  %2630 = vmatmul.mubr.f32.vlgmr.msra.gmra.mrb[36].mxu1 %v4144_v5 }
 0x6f7   :  { %3170 = vmatpush1.bf16.msra.mxu0 %v3591_v20  ;;  %3201 = vmatpush3.bf16.msra.mxu1 %v3747_v0  ;;  %v173_v20 = vld [vmem:[#allocation8] sm:$0xff] }
 0x6f8   :  { %3172 = vmatprep.subr.bf16.mxu0 %v3593_v28  ;;  %3202 = vmatprep.subr.bf16.mxu1 %v4320_v14  ;;  %v174_v28 = vld [vmem:[#allocation8 + $0x8] sm:$0xff] }
 0x6f9   :  { %1779 = vmatprep.mubr.f32.mxu0 %v4319_v40  ;;  %2664 = vmatprep.mubr.msk.f32.mxu1 %vm3478_vm0, %v4319_v40  ;;  %v176_v40 = vld [vmem:[#allocation8 + $0x18] sm:$0xff] }
 0x6fa   :  { %v3227_v15 = vpack.c.bf16 %v176_v40, %v175_v47 }
 0x6fb   :  { %3174 = vmatpush1.bf16.msra.mxu0 %v3605_v36  ;;  %3204 = vmatpush3.bf16.msra.mxu1 %v3758_v49  ;;  %v3223_v36 = vpack.c.bf16 %v174_v28, %v173_v20 }
 0x6fc   :  { %3176 = vmatprep.subr.bf16.mxu0 %v3608_v42  ;;  %3205 = vmatprep.subr.bf16.mxu1 %v4320_v14 }
 0x6ff   :  { %3178 = vmatpush1.bf16.msra.mxu0 %v3619_v52  ;;  %3207 = vmatpush3.bf16.msra.mxu1 %v3768_v54 }
 0x700   :  { %3180 = vmatprep.subr.bf16.mxu0 %v3622_v56  ;;  %3208 = vmatprep.subr.bf16.mxu1 %v4320_v14 }
 0x703   :  { %3182 = vmatpush1.bf16.msra.mxu0 %v3633_v3  ;;  %3210 = vmatpush3.bf16.msra.mxu1 %v3778_v58 }
 0x704   :  { %3184 = vmatprep.subr.bf16.mxu0 %v3636_v8  ;;  %3211 = vmatprep.subr.bf16.mxu1 %v4320_v14 }
 0x707   :  { %3186 = vmatpush1.bf16.msra.mxu0 %v3647_v21  ;;  %3213 = vmatpush3.bf16.msra.mxu1 %v3785_v62 }
 0x708   :  { %3188 = vmatprep.subr.bf16.mxu0 %v3650_v25  ;;  %3214 = vmatprep.subr.bf16.mxu1 %v4320_v14 }
 0x70b   :  { %3190 = vmatpush1.bf16.msra.mxu0 %v3659_v37  ;;  %3216 = vmatpush3.bf16.msra.mxu1 %v3791_v4 }
 0x70c   :  { %3192 = vmatprep.subr.bf16.mxu0 %v3662_v41  ;;  %3217 = vmatprep.subr.bf16.mxu1 %v4320_v14 }
 0x70f   :  { %3194 = vmatpush1.bf16.msra.mxu0 %v3665_v48  ;;  %3219 = vmatpush3.bf16.msra.mxu1 %v3795_v7 }
 0x710   :  { %3196 = vmatprep.subr.bf16.mxu0 %v3668_v53  ;;  %3220 = vmatprep.subr.bf16.mxu1 %v4320_v14 }
 0x713   :  { %3198 = vmatpush1.bf16.msra.mxu0 %v3671_v60  ;;  %3222 = vmatpush3.bf16.msra.mxu1 %v3799_v11  ;;  %v1707_v11 = vpop.permute.xlu0 %1706 }
 0x714   :  { %3224 = vmatprep.subr.bf16.mxu0 %v3223_v36  ;;  %vm1708_vm7 = vcmp.eq.s32.totalorder %v1707_v11, 1 }
 0x7c9   :  { %v1606_v42 = vpop.f32.mrb[12].mxu0  ;;  %v1677_v52 = vpop.f32.mrb[36].mxu1 }
 0x7ca   :  { %v1681_v56 = vadd.f32 %v1606_v42, %v3843_v34  ;;  %v1608_v3 = vpop.f32.mrb[13].mxu0  ;;  %v2631_v8 = vpop.f32.mrb[37].mxu1  ;;  %v1695_v0 = vadd.f32 %v3868_v2, %v1677_v52 }
 0x7cb   :  { %v1688_v21 = vadd.f32 %v1608_v3, %v3845_v35 }
 0x7cc   :  { %v2146_v25 = vmul.f32 -1.442695, %v1681_v56 }
 0x7cd   :  { %v2147_v37 = vmul.f32 -1.442695, %v1688_v21 }
 0x7ce   :  { %3345 = vpow2.f32 %v2146_v25 }
 0x7cf   :  { %3347 = vpow2.f32 %v2147_v37 }
 0x7d8   :  { %v3346_v41 = vpop.eup %3345 }
 0x7d9   :  { %v1685_v48 = vadd.f32 1.0, %v3346_v41  ;;  %v3348_v53 = vpop.eup %3347 }
 0x7da   :  { %v1692_v60 = vadd.f32 1.0, %v3348_v53 }
 0x7db   :  { %3349 = vrcp.f32 %v1685_v48 }
 0x7dc   :  { %3351 = vrcp.f32 %v1692_v60 }
 0x7e5   :  { %v3350_v49 = vpop.eup %3349 }
 0x7e6   :  { %v1696_v54 = vmul.f32 %v3350_v49, %v1695_v0  ;;  %v3352_v62 = vpop.eup %3351  ;;  %v1882_v0 = vpop.permute.xlu1 %1881 }
 0x7e7   :  { %v1699_v4 = vsub.f32 1.0, %v3352_v62  ;;  %v1701_v35 = vmul.f32 %v3352_v62, %v4144_v5  ;;  %vm1883_vm8 = vcmp.eq.s32.totalorder %v1882_v0, 1 }
 0x7e8   :  { %v1697_v58 = vadd.f32 %v1696_v54, %v3863_v55  ;;  %v3231_v55 = vpack.c.bf16 %v178_v27, %v177_v57 }
 0x7ea   :  { %3353 = vtanh.f32 %v1697_v58 }
 0x7f4   :  { %v3354_v7 = vpop.eup %3353 }
 0x7f5   :  { %v1700_v34 = vmul.f32 %v3354_v7, %v1699_v4 }
 0x7f7   :  { %v1702_v14 = vadd.f32 %v1701_v35, %v1700_v34 }
 0x7f9   :  { %v4188_v17 = vsel %vm1708_vm7, %v1702_v14, %v4144_v5 }
 0x7fa   :  { %1780 = vmatmul.mubr.f32.vlgmr.msra.gmra.mrb[14].mxu0 %v4188_v17  ;;  %2665 = vmatmul.mubr.f32.vlgmr.msra.gmra.mrb[38].mxu1 %v4188_v17 }
 0x7fb   :  { %3226 = vmatpush3.bf16.msra.mxu0 %v3223_v36  ;;  %2699 = vmatprep.mubr.msk.f32.mxu0 %vm659_vm1, %v3873_v61  ;;  %v3247_v61 = vpack.c.bf16 %v186_v44, %v185_v31 }
 0x7fc   :  { %3228 = vmatprep.subr.bf16.mxu0 %v3227_v15 }
 0x7ff   :  { %3230 = vmatpush3.bf16.msra.mxu0 %v3227_v15 }
 0x800   :  { %3232 = vmatprep.subr.bf16.mxu0 %v3231_v55 }
 0x803   :  { %3234 = vmatpush3.bf16.msra.mxu0 %v3231_v55 }
 0x804   :  { %3236 = vmatprep.subr.bf16.mxu0 %v3235_v29 }
 0x807   :  { %3238 = vmatpush3.bf16.msra.mxu0 %v3235_v29 }
 0x808   :  { %3240 = vmatprep.subr.bf16.mxu0 %v3239_v19 }
 0x80b   :  { %3242 = vmatpush3.bf16.msra.mxu0 %v3239_v19 }
 0x80c   :  { %3244 = vmatprep.subr.bf16.mxu0 %v3243_v32 }
 0x80f   :  { %3246 = vmatpush3.bf16.msra.mxu0 %v3243_v32 }
 0x810   :  { %3248 = vmatprep.subr.bf16.mxu0 %v3247_v61 }
 0x813   :  { %3250 = vmatpush3.bf16.msra.mxu0 %v3247_v61 }
 0x814   :  { %3252 = vmatprep.subr.bf16.mxu0 %v3251_v50 }
 0x817   :  { %3254 = vmatpush3.bf16.msra.mxu0 %v3251_v50 }
 0x81a   :  { %2700 = vmatmul.mubr.msk.f32.vlgmr.msra.gmra.mrb[16].mxu0 %vm833_vm2, %v3926_v13 }
 0x81b   :  { %2702 = vmatprep.mubr.msk.f32.mxu0 %vm1008_vm3, %v3978_v59 }
 0x81e   :  { %2703 = vmatmul.mubr.msk.f32.gmra.mrb[18].mxu0 %vm1183_vm4, %v4031_v63 }
 0x81f   :  { %2705 = vmatprep.mubr.msk.f32.mxu0 %vm1358_vm5, %v4084_v1 }
 0x822   :  { %2706 = vmatmul.mubr.msk.f32.gmra.mrb[20].mxu0 %vm1533_vm6, %v4137_v26 }
 0x823   :  { %2708 = vmatprep.mubr.msk.f32.mxu0 %vm1708_vm7, %v1702_v14 }
 0x8cd   :  { %v1781_v6 = vpop.f32.mrb[14].mxu0  ;;  %v1852_v13 = vpop.f32.mrb[38].mxu1 }
 0x8ce   :  { %v1856_v18 = vadd.f32 %v1781_v6, %v3847_v38  ;;  %v1783_v16 = vpop.f32.mrb[15].mxu0  ;;  %v2666_v59 = vpop.f32.mrb[39].mxu1  ;;  %v1870_v26 = vadd.f32 %v3868_v2, %v1852_v13  ;;  %v2150_v38 = vld [vmem:[%s4313_s6] ss:$0 sm:$0xff] }
 0x8cf   :  { %v1863_v5 = vadd.f32 %v1783_v16, %v3849_v39 }
 0x8d0   :  { %v2148_v22 = vmul.f32 -1.442695, %v1856_v18 }
 0x8d1   :  { %v2149_v63 = vmul.f32 -1.442695, %v1863_v5 }
 0x8d2   :  { %3355 = vpow2.f32 %v2148_v22 }
 0x8d3   :  { %3357 = vpow2.f32 %v2149_v63 }
 0x8dc   :  { %v3356_v10 = vpop.eup %3355 }
 0x8dd   :  { %v1860_v1 = vadd.f32 1.0, %v3356_v10  ;;  %v3358_v20 = vpop.eup %3357 }
 0x8de   :  { %v1867_v24 = vadd.f32 1.0, %v3358_v20 }
 0x8df   :  { %3359 = vrcp.f32 %v1860_v1 }
 0x8e0   :  { %3361 = vrcp.f32 %v1867_v24 }
 0x8e9   :  { %v3360_v28 = vpop.eup %3359 }
 0x8ea   :  { %v1871_v36 = vmul.f32 %v3360_v28, %v1870_v26  ;;  %v3362_v25 = vpop.eup %3361 }
 0x8eb   :  { %v1874_v53 = vsub.f32 1.0, %v3362_v25  ;;  %v1876_v54 = vmul.f32 %v3362_v25, %v4188_v17 }
 0x8ec   :  { %v1872_v39 = vadd.f32 %v3861_v51, %v1871_v36 }
 0x8ed   :  { %v2701_v42 = vpop.f32.mrb[16].mxu0 }
 0x8ee   :  { %3363 = vtanh.f32 %v1872_v39  ;;  %v4218_v52 = vadd.f32 %v2701_v42, %v2150_v38  ;;  %v1966_v56 = vpop.f32.mrb[17].mxu0 }
 0x8ef   :  { %v4220_v3 = vadd.f32 %v2150_v38, %v1966_v56 }
 0x8f0   :  { %2007 = vmax.xlane.f32.xlu1 %v4218_v52 }
 0x8f1   :  { %v2704_v8 = vpop.f32.mrb[18].mxu0  ;;  %2005 = vmax.xlane.f32.xlu0 %v4220_v3 }
 0x8f2   :  { %v4224_v2 = vadd.f32 %v2704_v8, %v2150_v38  ;;  %v1976_v21 = vpop.f32.mrb[19].mxu0 }
 0x8f3   :  { %v4227_v41 = vadd.f32 %v2150_v38, %v1976_v21 }
 0x8f5   :  { %v2707_v37 = vpop.f32.mrb[20].mxu0  ;;  %2011 = vmax.xlane.f32.xlu0 %v4224_v2 }
 0x8f6   :  { %v1986_v51 = vpop.f32.mrb[21].mxu0  ;;  %v4234_v58 = vadd.f32 %v2707_v37, %v2150_v38 }
 0x8f7   :  { %v4229_v48 = vadd.f32 %v2150_v38, %v1986_v51 }
 0x8f8   :  { %v3364_v60 = vpop.eup %3363 }
 0x8f9   :  { %2013 = vmax.xlane.f32.xlu1 %v4229_v48  ;;  %2009 = vmax.xlane.f32.xlu0 %v4227_v41  ;;  %v1875_v49 = vmul.f32 %v3364_v60, %v1874_v53 }
 0x8fb   :  { %v1877_v62 = vadd.f32 %v1876_v54, %v1875_v49 }
 0x8fd   :  { %2015 = vmax.xlane.f32.xlu0 %v4234_v58  ;;  %2709 = vmatmul.mubr.msk.f32.gmra.mrb[22].mxu0 %vm1883_vm8, %v1877_v62 }
 0x97d   :  { %v4241_v11 = vpop.xlane.xlu1 %2007 }
 0x97e   :  { %v4237_v4 = vpop.xlane.xlu0 %2005  ;;  %v2022_v35 = vsub.f32 %v4218_v52, %v4241_v11 }
 0x97f   :  { %v2021_v47 = vsub.f32 %v4220_v3, %v4237_v4 }
 0x980   :  { %v2031_v40 = vmul.f32 1.442695, %v2022_v35 }
 0x981   :  { %v2029_v15 = vmul.f32 1.442695, %v2021_v47 }
 0x982   :  { %v4239_v7 = vpop.xlane.xlu0 %2011  ;;  %3365 = vpow2.f32 %v2031_v40 }
 0x983   :  { %v2024_v14 = vsub.f32 %v4224_v2, %v4239_v7  ;;  %3367 = vpow2.f32 %v2029_v15 }
 0x985   :  { %v2035_v55 = vmul.f32 1.442695, %v2024_v14 }
 0x986   :  { %v4243_v34 = vpop.xlane.xlu0 %2009  ;;  %v4255_v27 = vpop.xlane.xlu1 %2013 }
 0x987   :  { %v2023_v17 = vsub.f32 %v4227_v41, %v4243_v34  ;;  %v2025_v9 = vsub.f32 %v4229_v48, %v4255_v27  ;;  %3369 = vpow2.f32 %v2035_v55 }
 0x989   :  { %v2033_v29 = vmul.f32 1.442695, %v2023_v17  ;;  %v2037_v19 = vmul.f32 1.442695, %v2025_v9 }
 0x98a   :  { %v4253_v57 = vpop.xlane.xlu0 %2015 }
 0x98b   :  { %v2026_v46 = vsub.f32 %v4234_v58, %v4253_v57  ;;  %3371 = vpow2.f32 %v2033_v29 }
 0x98c   :  { %v3366_v31 = vpop.eup %3365 }
 0x98d   :  { %v2039_v43 = vmul.f32 1.442695, %v2026_v46  ;;  %v3368_v44 = vpop.eup %3367 }
 0x98f   :  { %3373 = vpow2.f32 %v2039_v43 }
 0x990   :  { %3375 = vpow2.f32 %v2037_v19 }
 0x991   :  { %v3370_v61 = vpop.eup %3369 }
 0x995   :  { %v3372_v12 = vpop.eup %3371 }
 0x999   :  { %v3374_v33 = vpop.eup %3373 }
 0x99a   :  { %v3376_v50 = vpop.eup %3375 }
 0x9d0   :  { %v2710_v30 = vpop.f32.mrb[22].mxu0 }
 0x9d1   :  { %v4261_v23 = vadd.f32 %v2710_v30, %v2150_v38  ;;  %v1996_v45 = vpop.f32.mrb[23].mxu0 }
 0x9d2   :  { %v4263_v32 = vadd.f32 %v2150_v38, %v1996_v45 }
 0x9d3   :  { %2019 = vmax.xlane.f32.xlu0 %v4261_v23 }
 0x9d4   :  { %2017 = vmax.xlane.f32.xlu1 %v4263_v32 }
 0x9d7   :  { %2047 = vadd.xlane.f32.xlu0 %v3366_v31 }
 0x9d8   :  { %2045 = vadd.xlane.f32.xlu1 %v3368_v44 }
 0x9db   :  { %2051 = vadd.xlane.f32.xlu0 %v3370_v61 }
 0x9dc   :  { %2049 = vadd.xlane.f32.xlu1 %v3372_v12 }
 0x9df   :  { %2055 = vadd.xlane.f32.xlu0 %v3374_v33 }
 0x9e0   :  { %2053 = vadd.xlane.f32.xlu1 %v3376_v50 }
 0xa60   :  { %v2020_v6 = vpop.xlane.xlu0 %2019 }
 0xa61   :  { %v2028_v13 = vsub.f32 %v4261_v23, %v2020_v6  ;;  %v2018_v18 = vpop.xlane.xlu1 %2017 }
 0xa62   :  { %v2027_v16 = vsub.f32 %v4263_v32, %v2018_v18 }
 0xa63   :  { %v2043_v59 = vmul.f32 1.442695, %v2028_v13 }
 0xa64   :  { %v2041_v5 = vmul.f32 1.442695, %v2027_v16  ;;  %v2048_v22 = vpop.xlane.xlu0 %2047 }
 0xa65   :  { %3377 = vpow2.f32 %v2043_v59  ;;  %v2046_v63 = vpop.xlane.xlu1 %2045 }
 0xa66   :  { %3379 = vpow2.f32 %v2041_v5 }
 0xa67   :  { %3381 = vlog2.f32 %v2048_v22 }
 0xa68   :  { %3383 = vlog2.f32 %v2046_v63  ;;  %v2052_v10 = vpop.xlane.xlu0 %2051 }
 0xa69   :  { %3385 = vlog2.f32 %v2052_v10  ;;  %v2050_v1 = vpop.xlane.xlu1 %2049 }
 0xa6a   :  { %3387 = vlog2.f32 %v2050_v1 }
 0xa6c   :  { %v2056_v20 = vpop.xlane.xlu0 %2055 }
 0xa6d   :  { %3389 = vlog2.f32 %v2056_v20  ;;  %v2054_v24 = vpop.xlane.xlu1 %2053 }
 0xa6e   :  { %3391 = vlog2.f32 %v2054_v24 }
 0xa6f   :  { %v3378_v26 = vpop.eup %3377 }
 0xa70   :  { %v3380_v28 = vpop.eup %3379  ;;  %2059 = vadd.xlane.f32.xlu0 %v3378_v26 }
 0xa71   :  { %v3382_v36 = vpop.eup %3381  ;;  %2057 = vadd.xlane.f32.xlu1 %v3380_v28 }
 0xa72   :  { %v3384_v38 = vpop.eup %3383  ;;  %v2064_v39 = vmul.f32 0.6931472, %v3382_v36 }
 0xa73   :  { %v3386_v42 = vpop.eup %3385  ;;  %v2062_v56 = vmul.f32 0.6931472, %v3384_v38 }
 0xa74   :  { %v3388_v8 = vpop.eup %3387  ;;  %v2078_v21 = vadd.f32 %v2064_v39, %v4241_v11  ;;  %v2068_v25 = vmul.f32 0.6931472, %v3386_v42 }
 0xa75   :  { %v2077_v37 = vadd.f32 %v2062_v56, %v4237_v4  ;;  %v2066_v51 = vmul.f32 0.6931472, %v3388_v8 }
 0xa76   :  { %v2086_v53 = vsub.f32 %v4218_v52, %v2078_v21  ;;  %v2080_v60 = vadd.f32 %v2068_v25, %v4239_v7 }
 0xa77   :  { %v3390_v0 = vpop.eup %3389  ;;  %v2085_v49 = vsub.f32 %v4220_v3, %v2077_v37  ;;  %v2079_v54 = vadd.f32 %v2066_v51, %v4243_v34 }
 0xa78   :  { %v3392_v62 = vpop.eup %3391  ;;  %2094 = vst [vmem:[%s4314_s7 + $0x8] sm:$0xff] %v2086_v53  ;;  %v2088_v11 = vsub.f32 %v4224_v2, %v2080_v60  ;;  %v2072_v35 = vmul.f32 0.6931472, %v3390_v0 }
 0xa79   :  { %2093 = vst [vmem:[%s4314_s7] sm:$0xff] %v2085_v49  ;;  %v2087_v52 = vsub.f32 %v4227_v41, %v2079_v54  ;;  %v2070_v4 = vmul.f32 0.6931472, %v3392_v62 }
 0xa7a   :  { %2096 = vst [vmem:[%s4314_s7 + $0x18] sm:$0xff] %v2088_v11  ;;  %v2082_v3 = vadd.f32 %v2072_v35, %v4253_v57 }
 0xa7b   :  { %2095 = vst [vmem:[%s4314_s7 + $0x10] sm:$0xff] %v2087_v52  ;;  %v2081_v2 = vadd.f32 %v2070_v4, %v4255_v27 }
 0xa7c   :  { %v2090_v7 = vsub.f32 %v4234_v58, %v2082_v3 }
 0xa7d   :  { %v2089_v34 = vsub.f32 %v4229_v48, %v2081_v2 }
 0xa7e   :  { %2098 = vst [vmem:[%s4314_s7 + $0x28] sm:$0xff] %v2090_v7 }
 0xa7f   :  { %2097 = vst [vmem:[%s4314_s7 + $0x20] sm:$0xff] %v2089_v34 }
 0xafd   :  { %v2060_v41 = vpop.xlane.xlu0 %2059 }
 0xafe   :  { %3393 = vlog2.f32 %v2060_v41  ;;  %v2058_v47 = vpop.xlane.xlu1 %2057 }
 0xaff   :  { %3395 = vlog2.f32 %v2058_v47 }
 0xb08   :  { %v3394_v40 = vpop.eup %3393 }
 0xb09   :  { %v3396_v14 = vpop.eup %3395  ;;  %v2076_v15 = vmul.f32 0.6931472, %v3394_v40 }
 0xb0a   :  { %v2074_v17 = vmul.f32 0.6931472, %v3396_v14 }
 0xb0b   :  { %v2084_v57 = vadd.f32 %v2076_v15, %v2020_v6 }
 0xb0c   :  { %v2083_v58 = vadd.f32 %v2074_v17, %v2018_v18 }
 0xb0d   :  { %v2092_v48 = vsub.f32 %v4261_v23, %v2084_v57 }
 0xb0e   :  { %v2091_v27 = vsub.f32 %v4263_v32, %v2083_v58 }
 0xb0f   :  { %2100 = vst [vmem:[%s4314_s7 + $0x38] sm:$0xff] %v2092_v48 }
 0xb10   :  { %2099 = vst [vmem:[%s4314_s7 + $0x30] sm:$0xff] %v2091_v27 }
 0xb11   :  { %2105 = vsyncpa [#allocation5], 1 }
 0xb12   :  { %2106 = vsyncpa [#allocation7], 1 }

</bundles_post_ra>
